<compile_context>
chip_gen: v5e
topology: v5e:2x2
jax: 0.10.0
libtpu: 0.0.40
codegen_flags: <defaults>
</compile_context>

<pallas_src>
import functools

import jax
import jax.numpy as jnp
import numpy as np
from jax.experimental import pallas as pl
from jax.experimental.pallas import tpu as pltpu

BETA = 0.9
THRESHOLD = 1.0


def _round_up(n, m):
    return ((n + m - 1) // m) * m


def snn_kernel(x_ref, w1_ref, b1_ref, w2_ref, b2_ref, out_ref, spk1_ref, *,
               num_steps, o_real, chunk):
    # x_ref:  (TB, I_PAD)            w1_ref: (I_PAD, 128)   b1_ref: (1, 128)
    # w2_ref: (128, O_PAD) [zero-padded cols]               b2_ref: (1, O_PAD)
    # out_ref: (TB, O_PAD)  packed output, lane = t*o_real + o
    # spk1_ref: (num_steps*TB, 128) VMEM scratch for layer-1 spikes
    TB = x_ref.shape[0]
    out_w = out_ref.shape[1]
    spk_dtype = spk1_ref.dtype

    # fc1 runs once: x is constant over timesteps, so cur1 is too.
    cur1 = jnp.dot(x_ref[...], w1_ref[...],
                   preferred_element_type=jnp.float32) + b1_ref[...]

    # Phase 1: layer-1 LIF recurrence (pure VPU), fully unrolled.
    # Each timestep's spk1 lands in the lane-dense VMEM scratch.
    mem1 = jnp.zeros(cur1.shape, jnp.float32)
    for t in range(num_steps):
        rst1 = (mem1 > THRESHOLD).astype(jnp.float32)
        mem1 = BETA * mem1 + cur1 - rst1 * THRESHOLD
        spk1_ref[pl.ds(t * TB, TB), :] = (mem1 > THRESHOLD).astype(spk_dtype)

    # Phases 2+3 interleaved: fc2 in timestep chunks (>= chunk*TB MXU rows per
    # dot), layer-2 LIF recurrence, spikes packed into disjoint lanes of the
    # single (TB, out_w) output slab.
    out_ref[...] = jnp.zeros_like(out_ref)
    mem2 = jnp.zeros((TB, out_w), jnp.float32)
    for c0 in range(0, num_steps, chunk):
        csz = min(chunk, num_steps - c0)
        cur2_c = jnp.dot(spk1_ref[pl.ds(c0 * TB, csz * TB), :], w2_ref[...],
                         preferred_element_type=jnp.float32) + b2_ref[...]
        for s in range(csz):
            t = c0 + s
            cur2 = cur2_c[s * TB:(s + 1) * TB, :]
            rst2 = (mem2 > THRESHOLD).astype(jnp.float32)
            mem2 = BETA * mem2 + cur2 - rst2 * THRESHOLD
            spk2 = (mem2 > THRESHOLD).astype(jnp.float32)
            # Padded w2/b2 columns are exactly zero => mem2/spk2 lanes >= o_real
            # are exactly zero, so an XLU roll by t*o_real places the o_real real
            # lanes into their packed slot with zeros everywhere else.
            shift = t * o_real
            rolled = spk2 if shift == 0 else pltpu.roll(spk2, shift, 1)
            out_ref[...] += rolled


def snn_forward(x, w1, b1, w2, b2, num_steps=25, use_bf16=True):
    """x: (B, 1, 28, 28); w1: (128, 784); b1: (128,); w2: (2, 128); b2: (2,).

    Returns spk2_rec of shape (num_steps, B, 2) (f32), matching the PyTorch
    module. use_bf16=True runs fc1/fc2 inputs in bf16 with f32 accumulation
    (spikes are exact in bf16); use_bf16=False is the bit-stable f32 path.
    """
    B = x.shape[0]
    x2 = x.reshape(B, -1).astype(jnp.float32)          # (B, 784), row-major like torch .view
    I = x2.shape[1]
    H = w1.shape[0]
    O = w2.shape[0]

    I_PAD = _round_up(I, 128)                          # 784 -> 896, lane-aligned fc1 LHS
    O_PAD = _round_up(num_steps * O, 128)              # packed-output lane width (>= 128)

    # Batch tile: <= 128 rows (keeps the unrolled recurrence register-resident),
    # >= 2 tiles once B >= 16 so the "parallel" grid axis can shard across the
    # two v7x TensorCores. bf16 spikes pack 16 rows/vreg -> 16-row alignment.
    row_align = 16 if use_bf16 else 8
    if B >= 16:
        TB = min(128, _round_up((B + 1) // 2, row_align))
    else:
        TB = _round_up(max(B, row_align), row_align)
    B_pad = _round_up(B, TB)
    grid_b = B_pad // TB

    x2 = jnp.pad(x2, ((0, B_pad - B), (0, I_PAD - I)))
    w1t = jnp.pad(jnp.asarray(w1, jnp.float32).T, ((0, I_PAD - I), (0, 0)))   # (896, 128)
    b1r = jnp.asarray(b1, jnp.float32).reshape(1, H)                          # (1, 128)
    w2p = jnp.pad(jnp.asarray(w2, jnp.float32).T, ((0, 0), (0, O_PAD - O)))   # (128, O_PAD)
    b2p = jnp.pad(jnp.asarray(b2, jnp.float32).reshape(1, O),
                  ((0, 0), (0, O_PAD - O)))                                   # (1, O_PAD)

    in_dtype = jnp.bfloat16 if use_bf16 else jnp.float32
    x2 = x2.astype(in_dtype)
    w1t = w1t.astype(in_dtype)
    w2p = w2p.astype(in_dtype)          # biases stay f32 (tiny, reduces rounding)
    spk_dtype = in_dtype                # {0,1} spikes are exact in bf16

    # fc2 timestep chunk: prefer an exact divisor of num_steps in [5, 8].
    chunk = next((c for c in (8, 7, 6, 5) if num_steps % c == 0),
                 min(8, num_steps))

    kernel = functools.partial(snn_kernel, num_steps=num_steps, o_real=O,
                               chunk=chunk)

    out_packed = pl.pallas_call(
        kernel,
        out_shape=jax.ShapeDtypeStruct((B_pad, O_PAD), jnp.float32),
        grid=(grid_b,),
        in_specs=[
            pl.BlockSpec((TB, I_PAD), lambda i: (i, 0)),     # x: tiled over batch
            pl.BlockSpec((I_PAD, H), lambda i: (0, 0)),      # weights stay VMEM-resident
            pl.BlockSpec((1, H), lambda i: (0, 0)),
            pl.BlockSpec((H, O_PAD), lambda i: (0, 0)),
            pl.BlockSpec((1, O_PAD), lambda i: (0, 0)),
        ],
        out_specs=pl.BlockSpec((TB, O_PAD), lambda i: (i, 0)),
        scratch_shapes=[pltpu.VMEM((num_steps * TB, H), spk_dtype)],
        compiler_params=pltpu.CompilerParams(
            dimension_semantics=("parallel",),               # batch tiles shard across TCs
            vmem_limit_bytes=32 * 1024 * 1024),
    )(x2, w1t, b1r, w2p, b2p)

    # Unpack lane = t*O + o  ->  (num_steps, B, O)
    out = out_packed[:B, :num_steps * O].reshape(B, num_steps, O)
    return jnp.transpose(out, (1, 0, 2))


def snn_ref(x, w1, b1, w2, b2, num_steps=25):
    """Pure-JAX reference replicating the PyTorch/snntorch forward."""
    B = x.shape[0]
    x2 = x.reshape(B, -1).astype(jnp.float32)
    cur1 = x2 @ w1.T + b1
    mem1 = jnp.zeros((B, w1.shape[0]), jnp.float32)
    mem2 = jnp.zeros((B, w2.shape[0]), jnp.float32)
    outs = []
    for _ in range(num_steps):
        rst1 = (mem1 > THRESHOLD).astype(jnp.float32)
        mem1 = BETA * mem1 + cur1 - rst1 * THRESHOLD
        spk1 = (mem1 > THRESHOLD).astype(jnp.float32)
        cur2 = spk1 @ w2.T + b2
        rst2 = (mem2 > THRESHOLD).astype(jnp.float32)
        mem2 = BETA * mem2 + cur2 - rst2 * THRESHOLD
        spk2 = (mem2 > THRESHOLD).astype(jnp.float32)
        outs.append(spk2)
    return jnp.stack(outs)


if __name__ == "__main__":
    key = jax.random.PRNGKey(0)
    kx, k1, k2, k3, k4 = jax.random.split(key, 5)

    B, num_steps = 2, 25
    x = jax.random.normal(kx, (B, 1, 28, 28), jnp.float32)

    # Deterministic params mimicking torch nn.Linear default init:
    # U(-1/sqrt(fan_in), 1/sqrt(fan_in)).
    bound1 = 1.0 / np.sqrt(28.0 * 28.0)
    w1 = jax.random.uniform(k1, (128, 784), jnp.float32, -bound1, bound1)
    b1 = jax.random.uniform(k2, (128,), jnp.float32, -bound1, bound1)
    bound2 = 1.0 / np.sqrt(128.0)
    w2 = jax.random.uniform(k3, (2, 128), jnp.float32, -bound2, bound2)
    b2 = jax.random.uniform(k4, (2,), jnp.float32, -bound2, bound2)

    ref = snn_ref(x, w1, b1, w2, b2, num_steps=num_steps)

    # f32 path: strict check against the reference.
    fwd32 = jax.jit(functools.partial(snn_forward, num_steps=num_steps,
                                      use_bf16=False))
    out32 = jax.block_until_ready(fwd32(x, w1, b1, w2, b2))
    assert out32.shape == (num_steps, B, 2) and out32.dtype == jnp.float32
    # Spikes are {0,1}; mean(|diff|) == fraction of flipped spikes. Allow a
    # vanishing fraction from MXU vs XLA accumulation-order differences.
    mm32 = float(jnp.mean(jnp.abs(out32 - ref)))
    assert mm32 <= 0.02, f"f32 mismatch fraction too large: {mm32}"

    # bf16 path (default/fast config): sanity check with a lenient bound,
    # since bf16 rounding of cur1/cur2 can move a few threshold crossings.
    fwd16 = jax.jit(functools.partial(snn_forward, num_steps=num_steps,
                                      use_bf16=True))
    out16 = jax.block_until_ready(fwd16(x, w1, b1, w2, b2))
    assert out16.shape == (num_steps, B, 2) and out16.dtype == jnp.float32
    mm16 = float(jnp.mean(jnp.abs(out16 - ref)))
    assert mm16 <= 0.1, f"bf16 mismatch fraction too large: {mm16}"

    print("KERNEL_OK")
</pallas_src>

<mosaic_0001>
module attributes {stable_mosaic.version = 11 : i64} {
  func.func @snn_kernel(%arg0: i32, %arg1: memref<8x896xf32, #tpu.memory_space<vmem>>, %arg2: memref<896x128xf32, #tpu.memory_space<vmem>>, %arg3: memref<1x128xf32, #tpu.memory_space<vmem>>, %arg4: memref<128x128xf32, #tpu.memory_space<vmem>>, %arg5: memref<1x128xf32, #tpu.memory_space<vmem>>, %arg6: memref<8x128xf32, #tpu.memory_space<vmem>>, %arg7: memref<200x128xf32, #tpu.memory_space<vmem>>) attributes {dimension_semantics = [#tpu.dimension_semantics<parallel>], iteration_bounds = array<i64: 1>, scalar_prefetch = 0 : i64, scratch_operands = 1 : i64, tpu.core_type = #tpu.core_type<tc>, window_params = [{transform_indices = @transform_0, window_bounds = array<i64: 8, 896>}, {pipeline_mode = #tpu.pipeline_mode<synchronous>, transform_indices = @transform_1, window_bounds = array<i64: 896, 128>}, {pipeline_mode = #tpu.pipeline_mode<synchronous>, transform_indices = @transform_2, window_bounds = array<i64: 1, 128>}, {pipeline_mode = #tpu.pipeline_mode<synchronous>, transform_indices = @transform_3, window_bounds = array<i64: 128, 128>}, {pipeline_mode = #tpu.pipeline_mode<synchronous>, transform_indices = @transform_4, window_bounds = array<i64: 1, 128>}, {transform_indices = @transform_5, window_bounds = array<i64: 8, 128>}]} {
    %c0 = arith.constant 0 : index
    %c0_0 = arith.constant 0 : index
    %0 = vector.load %arg1[%c0, %c0_0] : memref<8x896xf32, #tpu.memory_space<vmem>>, vector<8x896xf32>
    %c0_1 = arith.constant 0 : index
    %c0_2 = arith.constant 0 : index
    %1 = vector.load %arg2[%c0_1, %c0_2] : memref<896x128xf32, #tpu.memory_space<vmem>>, vector<896x128xf32>
    %cst = arith.constant dense<0.000000e+00> : vector<8x128xf32>
    %2 = tpu.matmul %0, %1, %cst {dimension_numbers = #tpu.dot_dimension_numbers<[1], [0], [0], [1], [0, 0, 1, 1], [], []>} : vector<8x896xf32>, vector<896x128xf32>, vector<8x128xf32> -> vector<8x128xf32>
    %c0_3 = arith.constant 0 : index
    %c0_4 = arith.constant 0 : index
    %3 = vector.load %arg3[%c0_3, %c0_4] : memref<1x128xf32, #tpu.memory_space<vmem>>, vector<1x128xf32>
    %4 = vector.broadcast %3 : vector<1x128xf32> to vector<8x128xf32>
    %5 = arith.addf %2, %4 : vector<8x128xf32>
    %cst_5 = arith.constant 0.000000e+00 : f32
    %6 = vector.broadcast %cst_5 : f32 to vector<8x128xf32>
    %cst_6 = arith.constant 1.000000e+00 : f32
    %7 = vector.broadcast %cst_6 : f32 to vector<8x128xf32>
    %8 = arith.cmpf ogt, %6, %7 : vector<8x128xf32>
    %9 = arith.extui %8 : vector<8x128xi1> to vector<8x128xi32>
    %10 = arith.sitofp %9 : vector<8x128xi32> to vector<8x128xf32>
    %cst_7 = arith.constant 0.899999976 : f32
    %11 = vector.broadcast %cst_7 : f32 to vector<8x128xf32>
    %12 = arith.mulf %11, %6 : vector<8x128xf32>
    %13 = arith.addf %12, %5 : vector<8x128xf32>
    %cst_8 = arith.constant 1.000000e+00 : f32
    %14 = vector.broadcast %cst_8 : f32 to vector<8x128xf32>
    %15 = arith.mulf %10, %14 : vector<8x128xf32>
    %16 = arith.subf %13, %15 : vector<8x128xf32>
    %cst_9 = arith.constant 1.000000e+00 : f32
    %17 = vector.broadcast %cst_9 : f32 to vector<8x128xf32>
    %18 = arith.cmpf ogt, %16, %17 : vector<8x128xf32>
    %19 = arith.extui %18 : vector<8x128xi1> to vector<8x128xi32>
    %20 = arith.sitofp %19 : vector<8x128xi32> to vector<8x128xf32>
    %c0_10 = arith.constant 0 : index
    %c0_11 = arith.constant 0 : index
    %21 = vector.load %arg7[%c0_10, %c0_11] : memref<200x128xf32, #tpu.memory_space<vmem>>, vector<8x128xf32>
    tpu.vector_store %arg7[%c0_10, %c0_11], %20 {strides = array<i32>} : memref<200x128xf32, #tpu.memory_space<vmem>>, vector<8x128xf32>,
    %cst_12 = arith.constant 1.000000e+00 : f32
    %22 = vector.broadcast %cst_12 : f32 to vector<8x128xf32>
    %23 = arith.cmpf ogt, %16, %22 : vector<8x128xf32>
    %24 = arith.extui %23 : vector<8x128xi1> to vector<8x128xi32>
    %25 = arith.sitofp %24 : vector<8x128xi32> to vector<8x128xf32>
    %cst_13 = arith.constant 0.899999976 : f32
    %26 = vector.broadcast %cst_13 : f32 to vector<8x128xf32>
    %27 = arith.mulf %26, %16 : vector<8x128xf32>
    %28 = arith.addf %27, %5 : vector<8x128xf32>
    %cst_14 = arith.constant 1.000000e+00 : f32
    %29 = vector.broadcast %cst_14 : f32 to vector<8x128xf32>
    %30 = arith.mulf %25, %29 : vector<8x128xf32>
    %31 = arith.subf %28, %30 : vector<8x128xf32>
    %cst_15 = arith.constant 1.000000e+00 : f32
    %32 = vector.broadcast %cst_15 : f32 to vector<8x128xf32>
    %33 = arith.cmpf ogt, %31, %32 : vector<8x128xf32>
    %34 = arith.extui %33 : vector<8x128xi1> to vector<8x128xi32>
    %35 = arith.sitofp %34 : vector<8x128xi32> to vector<8x128xf32>
    %c8 = arith.constant 8 : index
    %c0_16 = arith.constant 0 : index
    %36 = vector.load %arg7[%c8, %c0_16] : memref<200x128xf32, #tpu.memory_space<vmem>>, vector<8x128xf32>
    tpu.vector_store %arg7[%c8, %c0_16], %35 {strides = array<i32>} : memref<200x128xf32, #tpu.memory_space<vmem>>, vector<8x128xf32>,
    %cst_17 = arith.constant 1.000000e+00 : f32
    %37 = vector.broadcast %cst_17 : f32 to vector<8x128xf32>
    %38 = arith.cmpf ogt, %31, %37 : vector<8x128xf32>
    %39 = arith.extui %38 : vector<8x128xi1> to vector<8x128xi32>
    %40 = arith.sitofp %39 : vector<8x128xi32> to vector<8x128xf32>
    %cst_18 = arith.constant 0.899999976 : f32
    %41 = vector.broadcast %cst_18 : f32 to vector<8x128xf32>
    %42 = arith.mulf %41, %31 : vector<8x128xf32>
    %43 = arith.addf %42, %5 : vector<8x128xf32>
    %cst_19 = arith.constant 1.000000e+00 : f32
    %44 = vector.broadcast %cst_19 : f32 to vector<8x128xf32>
    %45 = arith.mulf %40, %44 : vector<8x128xf32>
    %46 = arith.subf %43, %45 : vector<8x128xf32>
    %cst_20 = arith.constant 1.000000e+00 : f32
    %47 = vector.broadcast %cst_20 : f32 to vector<8x128xf32>
    %48 = arith.cmpf ogt, %46, %47 : vector<8x128xf32>
    %49 = arith.extui %48 : vector<8x128xi1> to vector<8x128xi32>
    %50 = arith.sitofp %49 : vector<8x128xi32> to vector<8x128xf32>
    %c16 = arith.constant 16 : index
    %c0_21 = arith.constant 0 : index
    %51 = vector.load %arg7[%c16, %c0_21] : memref<200x128xf32, #tpu.memory_space<vmem>>, vector<8x128xf32>
    tpu.vector_store %arg7[%c16, %c0_21], %50 {strides = array<i32>} : memref<200x128xf32, #tpu.memory_space<vmem>>, vector<8x128xf32>,
    %cst_22 = arith.constant 1.000000e+00 : f32
    %52 = vector.broadcast %cst_22 : f32 to vector<8x128xf32>
    %53 = arith.cmpf ogt, %46, %52 : vector<8x128xf32>
    %54 = arith.extui %53 : vector<8x128xi1> to vector<8x128xi32>
    %55 = arith.sitofp %54 : vector<8x128xi32> to vector<8x128xf32>
    %cst_23 = arith.constant 0.899999976 : f32
    %56 = vector.broadcast %cst_23 : f32 to vector<8x128xf32>
    %57 = arith.mulf %56, %46 : vector<8x128xf32>
    %58 = arith.addf %57, %5 : vector<8x128xf32>
    %cst_24 = arith.constant 1.000000e+00 : f32
    %59 = vector.broadcast %cst_24 : f32 to vector<8x128xf32>
    %60 = arith.mulf %55, %59 : vector<8x128xf32>
    %61 = arith.subf %58, %60 : vector<8x128xf32>
    %cst_25 = arith.constant 1.000000e+00 : f32
    %62 = vector.broadcast %cst_25 : f32 to vector<8x128xf32>
    %63 = arith.cmpf ogt, %61, %62 : vector<8x128xf32>
    %64 = arith.extui %63 : vector<8x128xi1> to vector<8x128xi32>
    %65 = arith.sitofp %64 : vector<8x128xi32> to vector<8x128xf32>
    %c24 = arith.constant 24 : index
    %c0_26 = arith.constant 0 : index
    %66 = vector.load %arg7[%c24, %c0_26] : memref<200x128xf32, #tpu.memory_space<vmem>>, vector<8x128xf32>
    tpu.vector_store %arg7[%c24, %c0_26], %65 {strides = array<i32>} : memref<200x128xf32, #tpu.memory_space<vmem>>, vector<8x128xf32>,
    %cst_27 = arith.constant 1.000000e+00 : f32
    %67 = vector.broadcast %cst_27 : f32 to vector<8x128xf32>
    %68 = arith.cmpf ogt, %61, %67 : vector<8x128xf32>
    %69 = arith.extui %68 : vector<8x128xi1> to vector<8x128xi32>
    %70 = arith.sitofp %69 : vector<8x128xi32> to vector<8x128xf32>
    %cst_28 = arith.constant 0.899999976 : f32
    %71 = vector.broadcast %cst_28 : f32 to vector<8x128xf32>
    %72 = arith.mulf %71, %61 : vector<8x128xf32>
    %73 = arith.addf %72, %5 : vector<8x128xf32>
    %cst_29 = arith.constant 1.000000e+00 : f32
    %74 = vector.broadcast %cst_29 : f32 to vector<8x128xf32>
    %75 = arith.mulf %70, %74 : vector<8x128xf32>
    %76 = arith.subf %73, %75 : vector<8x128xf32>
    %cst_30 = arith.constant 1.000000e+00 : f32
    %77 = vector.broadcast %cst_30 : f32 to vector<8x128xf32>
    %78 = arith.cmpf ogt, %76, %77 : vector<8x128xf32>
    %79 = arith.extui %78 : vector<8x128xi1> to vector<8x128xi32>
    %80 = arith.sitofp %79 : vector<8x128xi32> to vector<8x128xf32>
    %c32 = arith.constant 32 : index
    %c0_31 = arith.constant 0 : index
    %81 = vector.load %arg7[%c32, %c0_31] : memref<200x128xf32, #tpu.memory_space<vmem>>, vector<8x128xf32>
    tpu.vector_store %arg7[%c32, %c0_31], %80 {strides = array<i32>} : memref<200x128xf32, #tpu.memory_space<vmem>>, vector<8x128xf32>,
    %cst_32 = arith.constant 1.000000e+00 : f32
    %82 = vector.broadcast %cst_32 : f32 to vector<8x128xf32>
    %83 = arith.cmpf ogt, %76, %82 : vector<8x128xf32>
    %84 = arith.extui %83 : vector<8x128xi1> to vector<8x128xi32>
    %85 = arith.sitofp %84 : vector<8x128xi32> to vector<8x128xf32>
    %cst_33 = arith.constant 0.899999976 : f32
    %86 = vector.broadcast %cst_33 : f32 to vector<8x128xf32>
    %87 = arith.mulf %86, %76 : vector<8x128xf32>
    %88 = arith.addf %87, %5 : vector<8x128xf32>
    %cst_34 = arith.constant 1.000000e+00 : f32
    %89 = vector.broadcast %cst_34 : f32 to vector<8x128xf32>
    %90 = arith.mulf %85, %89 : vector<8x128xf32>
    %91 = arith.subf %88, %90 : vector<8x128xf32>
    %cst_35 = arith.constant 1.000000e+00 : f32
    %92 = vector.broadcast %cst_35 : f32 to vector<8x128xf32>
    %93 = arith.cmpf ogt, %91, %92 : vector<8x128xf32>
    %94 = arith.extui %93 : vector<8x128xi1> to vector<8x128xi32>
    %95 = arith.sitofp %94 : vector<8x128xi32> to vector<8x128xf32>
    %c40 = arith.constant 40 : index
    %c0_36 = arith.constant 0 : index
    %96 = vector.load %arg7[%c40, %c0_36] : memref<200x128xf32, #tpu.memory_space<vmem>>, vector<8x128xf32>
    tpu.vector_store %arg7[%c40, %c0_36], %95 {strides = array<i32>} : memref<200x128xf32, #tpu.memory_space<vmem>>, vector<8x128xf32>,
    %cst_37 = arith.constant 1.000000e+00 : f32
    %97 = vector.broadcast %cst_37 : f32 to vector<8x128xf32>
    %98 = arith.cmpf ogt, %91, %97 : vector<8x128xf32>
    %99 = arith.extui %98 : vector<8x128xi1> to vector<8x128xi32>
    %100 = arith.sitofp %99 : vector<8x128xi32> to vector<8x128xf32>
    %cst_38 = arith.constant 0.899999976 : f32
    %101 = vector.broadcast %cst_38 : f32 to vector<8x128xf32>
    %102 = arith.mulf %101, %91 : vector<8x128xf32>
    %103 = arith.addf %102, %5 : vector<8x128xf32>
    %cst_39 = arith.constant 1.000000e+00 : f32
    %104 = vector.broadcast %cst_39 : f32 to vector<8x128xf32>
    %105 = arith.mulf %100, %104 : vector<8x128xf32>
    %106 = arith.subf %103, %105 : vector<8x128xf32>
    %cst_40 = arith.constant 1.000000e+00 : f32
    %107 = vector.broadcast %cst_40 : f32 to vector<8x128xf32>
    %108 = arith.cmpf ogt, %106, %107 : vector<8x128xf32>
    %109 = arith.extui %108 : vector<8x128xi1> to vector<8x128xi32>
    %110 = arith.sitofp %109 : vector<8x128xi32> to vector<8x128xf32>
    %c48 = arith.constant 48 : index
    %c0_41 = arith.constant 0 : index
    %111 = vector.load %arg7[%c48, %c0_41] : memref<200x128xf32, #tpu.memory_space<vmem>>, vector<8x128xf32>
    tpu.vector_store %arg7[%c48, %c0_41], %110 {strides = array<i32>} : memref<200x128xf32, #tpu.memory_space<vmem>>, vector<8x128xf32>,
    %cst_42 = arith.constant 1.000000e+00 : f32
    %112 = vector.broadcast %cst_42 : f32 to vector<8x128xf32>
    %113 = arith.cmpf ogt, %106, %112 : vector<8x128xf32>
    %114 = arith.extui %113 : vector<8x128xi1> to vector<8x128xi32>
    %115 = arith.sitofp %114 : vector<8x128xi32> to vector<8x128xf32>
    %cst_43 = arith.constant 0.899999976 : f32
    %116 = vector.broadcast %cst_43 : f32 to vector<8x128xf32>
    %117 = arith.mulf %116, %106 : vector<8x128xf32>
    %118 = arith.addf %117, %5 : vector<8x128xf32>
    %cst_44 = arith.constant 1.000000e+00 : f32
    %119 = vector.broadcast %cst_44 : f32 to vector<8x128xf32>
    %120 = arith.mulf %115, %119 : vector<8x128xf32>
    %121 = arith.subf %118, %120 : vector<8x128xf32>
    %cst_45 = arith.constant 1.000000e+00 : f32
    %122 = vector.broadcast %cst_45 : f32 to vector<8x128xf32>
    %123 = arith.cmpf ogt, %121, %122 : vector<8x128xf32>
    %124 = arith.extui %123 : vector<8x128xi1> to vector<8x128xi32>
    %125 = arith.sitofp %124 : vector<8x128xi32> to vector<8x128xf32>
    %c56 = arith.constant 56 : index
    %c0_46 = arith.constant 0 : index
    %126 = vector.load %arg7[%c56, %c0_46] : memref<200x128xf32, #tpu.memory_space<vmem>>, vector<8x128xf32>
    tpu.vector_store %arg7[%c56, %c0_46], %125 {strides = array<i32>} : memref<200x128xf32, #tpu.memory_space<vmem>>, vector<8x128xf32>,
    %cst_47 = arith.constant 1.000000e+00 : f32
    %127 = vector.broadcast %cst_47 : f32 to vector<8x128xf32>
    %128 = arith.cmpf ogt, %121, %127 : vector<8x128xf32>
    %129 = arith.extui %128 : vector<8x128xi1> to vector<8x128xi32>
    %130 = arith.sitofp %129 : vector<8x128xi32> to vector<8x128xf32>
    %cst_48 = arith.constant 0.899999976 : f32
    %131 = vector.broadcast %cst_48 : f32 to vector<8x128xf32>
    %132 = arith.mulf %131, %121 : vector<8x128xf32>
    %133 = arith.addf %132, %5 : vector<8x128xf32>
    %cst_49 = arith.constant 1.000000e+00 : f32
    %134 = vector.broadcast %cst_49 : f32 to vector<8x128xf32>
    %135 = arith.mulf %130, %134 : vector<8x128xf32>
    %136 = arith.subf %133, %135 : vector<8x128xf32>
    %cst_50 = arith.constant 1.000000e+00 : f32
    %137 = vector.broadcast %cst_50 : f32 to vector<8x128xf32>
    %138 = arith.cmpf ogt, %136, %137 : vector<8x128xf32>
    %139 = arith.extui %138 : vector<8x128xi1> to vector<8x128xi32>
    %140 = arith.sitofp %139 : vector<8x128xi32> to vector<8x128xf32>
    %c64 = arith.constant 64 : index
    %c0_51 = arith.constant 0 : index
    %141 = vector.load %arg7[%c64, %c0_51] : memref<200x128xf32, #tpu.memory_space<vmem>>, vector<8x128xf32>
    tpu.vector_store %arg7[%c64, %c0_51], %140 {strides = array<i32>} : memref<200x128xf32, #tpu.memory_space<vmem>>, vector<8x128xf32>,
    %cst_52 = arith.constant 1.000000e+00 : f32
    %142 = vector.broadcast %cst_52 : f32 to vector<8x128xf32>
    %143 = arith.cmpf ogt, %136, %142 : vector<8x128xf32>
    %144 = arith.extui %143 : vector<8x128xi1> to vector<8x128xi32>
    %145 = arith.sitofp %144 : vector<8x128xi32> to vector<8x128xf32>
    %cst_53 = arith.constant 0.899999976 : f32
    %146 = vector.broadcast %cst_53 : f32 to vector<8x128xf32>
    %147 = arith.mulf %146, %136 : vector<8x128xf32>
    %148 = arith.addf %147, %5 : vector<8x128xf32>
    %cst_54 = arith.constant 1.000000e+00 : f32
    %149 = vector.broadcast %cst_54 : f32 to vector<8x128xf32>
    %150 = arith.mulf %145, %149 : vector<8x128xf32>
    %151 = arith.subf %148, %150 : vector<8x128xf32>
    %cst_55 = arith.constant 1.000000e+00 : f32
    %152 = vector.broadcast %cst_55 : f32 to vector<8x128xf32>
    %153 = arith.cmpf ogt, %151, %152 : vector<8x128xf32>
    %154 = arith.extui %153 : vector<8x128xi1> to vector<8x128xi32>
    %155 = arith.sitofp %154 : vector<8x128xi32> to vector<8x128xf32>
    %c72 = arith.constant 72 : index
    %c0_56 = arith.constant 0 : index
    %156 = vector.load %arg7[%c72, %c0_56] : memref<200x128xf32, #tpu.memory_space<vmem>>, vector<8x128xf32>
    tpu.vector_store %arg7[%c72, %c0_56], %155 {strides = array<i32>} : memref<200x128xf32, #tpu.memory_space<vmem>>, vector<8x128xf32>,
    %cst_57 = arith.constant 1.000000e+00 : f32
    %157 = vector.broadcast %cst_57 : f32 to vector<8x128xf32>
    %158 = arith.cmpf ogt, %151, %157 : vector<8x128xf32>
    %159 = arith.extui %158 : vector<8x128xi1> to vector<8x128xi32>
    %160 = arith.sitofp %159 : vector<8x128xi32> to vector<8x128xf32>
    %cst_58 = arith.constant 0.899999976 : f32
    %161 = vector.broadcast %cst_58 : f32 to vector<8x128xf32>
    %162 = arith.mulf %161, %151 : vector<8x128xf32>
    %163 = arith.addf %162, %5 : vector<8x128xf32>
    %cst_59 = arith.constant 1.000000e+00 : f32
    %164 = vector.broadcast %cst_59 : f32 to vector<8x128xf32>
    %165 = arith.mulf %160, %164 : vector<8x128xf32>
    %166 = arith.subf %163, %165 : vector<8x128xf32>
    %cst_60 = arith.constant 1.000000e+00 : f32
    %167 = vector.broadcast %cst_60 : f32 to vector<8x128xf32>
    %168 = arith.cmpf ogt, %166, %167 : vector<8x128xf32>
    %169 = arith.extui %168 : vector<8x128xi1> to vector<8x128xi32>
    %170 = arith.sitofp %169 : vector<8x128xi32> to vector<8x128xf32>
    %c80 = arith.constant 80 : index
    %c0_61 = arith.constant 0 : index
    %171 = vector.load %arg7[%c80, %c0_61] : memref<200x128xf32, #tpu.memory_space<vmem>>, vector<8x128xf32>
    tpu.vector_store %arg7[%c80, %c0_61], %170 {strides = array<i32>} : memref<200x128xf32, #tpu.memory_space<vmem>>, vector<8x128xf32>,
    %cst_62 = arith.constant 1.000000e+00 : f32
    %172 = vector.broadcast %cst_62 : f32 to vector<8x128xf32>
    %173 = arith.cmpf ogt, %166, %172 : vector<8x128xf32>
    %174 = arith.extui %173 : vector<8x128xi1> to vector<8x128xi32>
    %175 = arith.sitofp %174 : vector<8x128xi32> to vector<8x128xf32>
    %cst_63 = arith.constant 0.899999976 : f32
    %176 = vector.broadcast %cst_63 : f32 to vector<8x128xf32>
    %177 = arith.mulf %176, %166 : vector<8x128xf32>
    %178 = arith.addf %177, %5 : vector<8x128xf32>
    %cst_64 = arith.constant 1.000000e+00 : f32
    %179 = vector.broadcast %cst_64 : f32 to vector<8x128xf32>
    %180 = arith.mulf %175, %179 : vector<8x128xf32>
    %181 = arith.subf %178, %180 : vector<8x128xf32>
    %cst_65 = arith.constant 1.000000e+00 : f32
    %182 = vector.broadcast %cst_65 : f32 to vector<8x128xf32>
    %183 = arith.cmpf ogt, %181, %182 : vector<8x128xf32>
    %184 = arith.extui %183 : vector<8x128xi1> to vector<8x128xi32>
    %185 = arith.sitofp %184 : vector<8x128xi32> to vector<8x128xf32>
    %c88 = arith.constant 88 : index
    %c0_66 = arith.constant 0 : index
    %186 = vector.load %arg7[%c88, %c0_66] : memref<200x128xf32, #tpu.memory_space<vmem>>, vector<8x128xf32>
    tpu.vector_store %arg7[%c88, %c0_66], %185 {strides = array<i32>} : memref<200x128xf32, #tpu.memory_space<vmem>>, vector<8x128xf32>,
    %cst_67 = arith.constant 1.000000e+00 : f32
    %187 = vector.broadcast %cst_67 : f32 to vector<8x128xf32>
    %188 = arith.cmpf ogt, %181, %187 : vector<8x128xf32>
    %189 = arith.extui %188 : vector<8x128xi1> to vector<8x128xi32>
    %190 = arith.sitofp %189 : vector<8x128xi32> to vector<8x128xf32>
    %cst_68 = arith.constant 0.899999976 : f32
    %191 = vector.broadcast %cst_68 : f32 to vector<8x128xf32>
    %192 = arith.mulf %191, %181 : vector<8x128xf32>
    %193 = arith.addf %192, %5 : vector<8x128xf32>
    %cst_69 = arith.constant 1.000000e+00 : f32
    %194 = vector.broadcast %cst_69 : f32 to vector<8x128xf32>
    %195 = arith.mulf %190, %194 : vector<8x128xf32>
    %196 = arith.subf %193, %195 : vector<8x128xf32>
    %cst_70 = arith.constant 1.000000e+00 : f32
    %197 = vector.broadcast %cst_70 : f32 to vector<8x128xf32>
    %198 = arith.cmpf ogt, %196, %197 : vector<8x128xf32>
    %199 = arith.extui %198 : vector<8x128xi1> to vector<8x128xi32>
    %200 = arith.sitofp %199 : vector<8x128xi32> to vector<8x128xf32>
    %c96 = arith.constant 96 : index
    %c0_71 = arith.constant 0 : index
    %201 = vector.load %arg7[%c96, %c0_71] : memref<200x128xf32, #tpu.memory_space<vmem>>, vector<8x128xf32>
    tpu.vector_store %arg7[%c96, %c0_71], %200 {strides = array<i32>} : memref<200x128xf32, #tpu.memory_space<vmem>>, vector<8x128xf32>,
    %cst_72 = arith.constant 1.000000e+00 : f32
    %202 = vector.broadcast %cst_72 : f32 to vector<8x128xf32>
    %203 = arith.cmpf ogt, %196, %202 : vector<8x128xf32>
    %204 = arith.extui %203 : vector<8x128xi1> to vector<8x128xi32>
    %205 = arith.sitofp %204 : vector<8x128xi32> to vector<8x128xf32>
    %cst_73 = arith.constant 0.899999976 : f32
    %206 = vector.broadcast %cst_73 : f32 to vector<8x128xf32>
    %207 = arith.mulf %206, %196 : vector<8x128xf32>
    %208 = arith.addf %207, %5 : vector<8x128xf32>
    %cst_74 = arith.constant 1.000000e+00 : f32
    %209 = vector.broadcast %cst_74 : f32 to vector<8x128xf32>
    %210 = arith.mulf %205, %209 : vector<8x128xf32>
    %211 = arith.subf %208, %210 : vector<8x128xf32>
    %cst_75 = arith.constant 1.000000e+00 : f32
    %212 = vector.broadcast %cst_75 : f32 to vector<8x128xf32>
    %213 = arith.cmpf ogt, %211, %212 : vector<8x128xf32>
    %214 = arith.extui %213 : vector<8x128xi1> to vector<8x128xi32>
    %215 = arith.sitofp %214 : vector<8x128xi32> to vector<8x128xf32>
    %c104 = arith.constant 104 : index
    %c0_76 = arith.constant 0 : index
    %216 = vector.load %arg7[%c104, %c0_76] : memref<200x128xf32, #tpu.memory_space<vmem>>, vector<8x128xf32>
    tpu.vector_store %arg7[%c104, %c0_76], %215 {strides = array<i32>} : memref<200x128xf32, #tpu.memory_space<vmem>>, vector<8x128xf32>,
    %cst_77 = arith.constant 1.000000e+00 : f32
    %217 = vector.broadcast %cst_77 : f32 to vector<8x128xf32>
    %218 = arith.cmpf ogt, %211, %217 : vector<8x128xf32>
    %219 = arith.extui %218 : vector<8x128xi1> to vector<8x128xi32>
    %220 = arith.sitofp %219 : vector<8x128xi32> to vector<8x128xf32>
    %cst_78 = arith.constant 0.899999976 : f32
    %221 = vector.broadcast %cst_78 : f32 to vector<8x128xf32>
    %222 = arith.mulf %221, %211 : vector<8x128xf32>
    %223 = arith.addf %222, %5 : vector<8x128xf32>
    %cst_79 = arith.constant 1.000000e+00 : f32
    %224 = vector.broadcast %cst_79 : f32 to vector<8x128xf32>
    %225 = arith.mulf %220, %224 : vector<8x128xf32>
    %226 = arith.subf %223, %225 : vector<8x128xf32>
    %cst_80 = arith.constant 1.000000e+00 : f32
    %227 = vector.broadcast %cst_80 : f32 to vector<8x128xf32>
    %228 = arith.cmpf ogt, %226, %227 : vector<8x128xf32>
    %229 = arith.extui %228 : vector<8x128xi1> to vector<8x128xi32>
    %230 = arith.sitofp %229 : vector<8x128xi32> to vector<8x128xf32>
    %c112 = arith.constant 112 : index
    %c0_81 = arith.constant 0 : index
    %231 = vector.load %arg7[%c112, %c0_81] : memref<200x128xf32, #tpu.memory_space<vmem>>, vector<8x128xf32>
    tpu.vector_store %arg7[%c112, %c0_81], %230 {strides = array<i32>} : memref<200x128xf32, #tpu.memory_space<vmem>>, vector<8x128xf32>,
    %cst_82 = arith.constant 1.000000e+00 : f32
    %232 = vector.broadcast %cst_82 : f32 to vector<8x128xf32>
    %233 = arith.cmpf ogt, %226, %232 : vector<8x128xf32>
    %234 = arith.extui %233 : vector<8x128xi1> to vector<8x128xi32>
    %235 = arith.sitofp %234 : vector<8x128xi32> to vector<8x128xf32>
    %cst_83 = arith.constant 0.899999976 : f32
    %236 = vector.broadcast %cst_83 : f32 to vector<8x128xf32>
    %237 = arith.mulf %236, %226 : vector<8x128xf32>
    %238 = arith.addf %237, %5 : vector<8x128xf32>
    %cst_84 = arith.constant 1.000000e+00 : f32
    %239 = vector.broadcast %cst_84 : f32 to vector<8x128xf32>
    %240 = arith.mulf %235, %239 : vector<8x128xf32>
    %241 = arith.subf %238, %240 : vector<8x128xf32>
    %cst_85 = arith.constant 1.000000e+00 : f32
    %242 = vector.broadcast %cst_85 : f32 to vector<8x128xf32>
    %243 = arith.cmpf ogt, %241, %242 : vector<8x128xf32>
    %244 = arith.extui %243 : vector<8x128xi1> to vector<8x128xi32>
    %245 = arith.sitofp %244 : vector<8x128xi32> to vector<8x128xf32>
    %c120 = arith.constant 120 : index
    %c0_86 = arith.constant 0 : index
    %246 = vector.load %arg7[%c120, %c0_86] : memref<200x128xf32, #tpu.memory_space<vmem>>, vector<8x128xf32>
    tpu.vector_store %arg7[%c120, %c0_86], %245 {strides = array<i32>} : memref<200x128xf32, #tpu.memory_space<vmem>>, vector<8x128xf32>,
    %cst_87 = arith.constant 1.000000e+00 : f32
    %247 = vector.broadcast %cst_87 : f32 to vector<8x128xf32>
    %248 = arith.cmpf ogt, %241, %247 : vector<8x128xf32>
    %249 = arith.extui %248 : vector<8x128xi1> to vector<8x128xi32>
    %250 = arith.sitofp %249 : vector<8x128xi32> to vector<8x128xf32>
    %cst_88 = arith.constant 0.899999976 : f32
    %251 = vector.broadcast %cst_88 : f32 to vector<8x128xf32>
    %252 = arith.mulf %251, %241 : vector<8x128xf32>
    %253 = arith.addf %252, %5 : vector<8x128xf32>
    %cst_89 = arith.constant 1.000000e+00 : f32
    %254 = vector.broadcast %cst_89 : f32 to vector<8x128xf32>
    %255 = arith.mulf %250, %254 : vector<8x128xf32>
    %256 = arith.subf %253, %255 : vector<8x128xf32>
    %cst_90 = arith.constant 1.000000e+00 : f32
    %257 = vector.broadcast %cst_90 : f32 to vector<8x128xf32>
    %258 = arith.cmpf ogt, %256, %257 : vector<8x128xf32>
    %259 = arith.extui %258 : vector<8x128xi1> to vector<8x128xi32>
    %260 = arith.sitofp %259 : vector<8x128xi32> to vector<8x128xf32>
    %c128 = arith.constant 128 : index
    %c0_91 = arith.constant 0 : index
    %261 = vector.load %arg7[%c128, %c0_91] : memref<200x128xf32, #tpu.memory_space<vmem>>, vector<8x128xf32>
    tpu.vector_store %arg7[%c128, %c0_91], %260 {strides = array<i32>} : memref<200x128xf32, #tpu.memory_space<vmem>>, vector<8x128xf32>,
    %cst_92 = arith.constant 1.000000e+00 : f32
    %262 = vector.broadcast %cst_92 : f32 to vector<8x128xf32>
    %263 = arith.cmpf ogt, %256, %262 : vector<8x128xf32>
    %264 = arith.extui %263 : vector<8x128xi1> to vector<8x128xi32>
    %265 = arith.sitofp %264 : vector<8x128xi32> to vector<8x128xf32>
    %cst_93 = arith.constant 0.899999976 : f32
    %266 = vector.broadcast %cst_93 : f32 to vector<8x128xf32>
    %267 = arith.mulf %266, %256 : vector<8x128xf32>
    %268 = arith.addf %267, %5 : vector<8x128xf32>
    %cst_94 = arith.constant 1.000000e+00 : f32
    %269 = vector.broadcast %cst_94 : f32 to vector<8x128xf32>
    %270 = arith.mulf %265, %269 : vector<8x128xf32>
    %271 = arith.subf %268, %270 : vector<8x128xf32>
    %cst_95 = arith.constant 1.000000e+00 : f32
    %272 = vector.broadcast %cst_95 : f32 to vector<8x128xf32>
    %273 = arith.cmpf ogt, %271, %272 : vector<8x128xf32>
    %274 = arith.extui %273 : vector<8x128xi1> to vector<8x128xi32>
    %275 = arith.sitofp %274 : vector<8x128xi32> to vector<8x128xf32>
    %c136 = arith.constant 136 : index
    %c0_96 = arith.constant 0 : index
    %276 = vector.load %arg7[%c136, %c0_96] : memref<200x128xf32, #tpu.memory_space<vmem>>, vector<8x128xf32>
    tpu.vector_store %arg7[%c136, %c0_96], %275 {strides = array<i32>} : memref<200x128xf32, #tpu.memory_space<vmem>>, vector<8x128xf32>,
    %cst_97 = arith.constant 1.000000e+00 : f32
    %277 = vector.broadcast %cst_97 : f32 to vector<8x128xf32>
    %278 = arith.cmpf ogt, %271, %277 : vector<8x128xf32>
    %279 = arith.extui %278 : vector<8x128xi1> to vector<8x128xi32>
    %280 = arith.sitofp %279 : vector<8x128xi32> to vector<8x128xf32>
    %cst_98 = arith.constant 0.899999976 : f32
    %281 = vector.broadcast %cst_98 : f32 to vector<8x128xf32>
    %282 = arith.mulf %281, %271 : vector<8x128xf32>
    %283 = arith.addf %282, %5 : vector<8x128xf32>
    %cst_99 = arith.constant 1.000000e+00 : f32
    %284 = vector.broadcast %cst_99 : f32 to vector<8x128xf32>
    %285 = arith.mulf %280, %284 : vector<8x128xf32>
    %286 = arith.subf %283, %285 : vector<8x128xf32>
    %cst_100 = arith.constant 1.000000e+00 : f32
    %287 = vector.broadcast %cst_100 : f32 to vector<8x128xf32>
    %288 = arith.cmpf ogt, %286, %287 : vector<8x128xf32>
    %289 = arith.extui %288 : vector<8x128xi1> to vector<8x128xi32>
    %290 = arith.sitofp %289 : vector<8x128xi32> to vector<8x128xf32>
    %c144 = arith.constant 144 : index
    %c0_101 = arith.constant 0 : index
    %291 = vector.load %arg7[%c144, %c0_101] : memref<200x128xf32, #tpu.memory_space<vmem>>, vector<8x128xf32>
    tpu.vector_store %arg7[%c144, %c0_101], %290 {strides = array<i32>} : memref<200x128xf32, #tpu.memory_space<vmem>>, vector<8x128xf32>,
    %cst_102 = arith.constant 1.000000e+00 : f32
    %292 = vector.broadcast %cst_102 : f32 to vector<8x128xf32>
    %293 = arith.cmpf ogt, %286, %292 : vector<8x128xf32>
    %294 = arith.extui %293 : vector<8x128xi1> to vector<8x128xi32>
    %295 = arith.sitofp %294 : vector<8x128xi32> to vector<8x128xf32>
    %cst_103 = arith.constant 0.899999976 : f32
    %296 = vector.broadcast %cst_103 : f32 to vector<8x128xf32>
    %297 = arith.mulf %296, %286 : vector<8x128xf32>
    %298 = arith.addf %297, %5 : vector<8x128xf32>
    %cst_104 = arith.constant 1.000000e+00 : f32
    %299 = vector.broadcast %cst_104 : f32 to vector<8x128xf32>
    %300 = arith.mulf %295, %299 : vector<8x128xf32>
    %301 = arith.subf %298, %300 : vector<8x128xf32>
    %cst_105 = arith.constant 1.000000e+00 : f32
    %302 = vector.broadcast %cst_105 : f32 to vector<8x128xf32>
    %303 = arith.cmpf ogt, %301, %302 : vector<8x128xf32>
    %304 = arith.extui %303 : vector<8x128xi1> to vector<8x128xi32>
    %305 = arith.sitofp %304 : vector<8x128xi32> to vector<8x128xf32>
    %c152 = arith.constant 152 : index
    %c0_106 = arith.constant 0 : index
    %306 = vector.load %arg7[%c152, %c0_106] : memref<200x128xf32, #tpu.memory_space<vmem>>, vector<8x128xf32>
    tpu.vector_store %arg7[%c152, %c0_106], %305 {strides = array<i32>} : memref<200x128xf32, #tpu.memory_space<vmem>>, vector<8x128xf32>,
    %cst_107 = arith.constant 1.000000e+00 : f32
    %307 = vector.broadcast %cst_107 : f32 to vector<8x128xf32>
    %308 = arith.cmpf ogt, %301, %307 : vector<8x128xf32>
    %309 = arith.extui %308 : vector<8x128xi1> to vector<8x128xi32>
    %310 = arith.sitofp %309 : vector<8x128xi32> to vector<8x128xf32>
    %cst_108 = arith.constant 0.899999976 : f32
    %311 = vector.broadcast %cst_108 : f32 to vector<8x128xf32>
    %312 = arith.mulf %311, %301 : vector<8x128xf32>
    %313 = arith.addf %312, %5 : vector<8x128xf32>
    %cst_109 = arith.constant 1.000000e+00 : f32
    %314 = vector.broadcast %cst_109 : f32 to vector<8x128xf32>
    %315 = arith.mulf %310, %314 : vector<8x128xf32>
    %316 = arith.subf %313, %315 : vector<8x128xf32>
    %cst_110 = arith.constant 1.000000e+00 : f32
    %317 = vector.broadcast %cst_110 : f32 to vector<8x128xf32>
    %318 = arith.cmpf ogt, %316, %317 : vector<8x128xf32>
    %319 = arith.extui %318 : vector<8x128xi1> to vector<8x128xi32>
    %320 = arith.sitofp %319 : vector<8x128xi32> to vector<8x128xf32>
    %c160 = arith.constant 160 : index
    %c0_111 = arith.constant 0 : index
    %321 = vector.load %arg7[%c160, %c0_111] : memref<200x128xf32, #tpu.memory_space<vmem>>, vector<8x128xf32>
    tpu.vector_store %arg7[%c160, %c0_111], %320 {strides = array<i32>} : memref<200x128xf32, #tpu.memory_space<vmem>>, vector<8x128xf32>,
    %cst_112 = arith.constant 1.000000e+00 : f32
    %322 = vector.broadcast %cst_112 : f32 to vector<8x128xf32>
    %323 = arith.cmpf ogt, %316, %322 : vector<8x128xf32>
    %324 = arith.extui %323 : vector<8x128xi1> to vector<8x128xi32>
    %325 = arith.sitofp %324 : vector<8x128xi32> to vector<8x128xf32>
    %cst_113 = arith.constant 0.899999976 : f32
    %326 = vector.broadcast %cst_113 : f32 to vector<8x128xf32>
    %327 = arith.mulf %326, %316 : vector<8x128xf32>
    %328 = arith.addf %327, %5 : vector<8x128xf32>
    %cst_114 = arith.constant 1.000000e+00 : f32
    %329 = vector.broadcast %cst_114 : f32 to vector<8x128xf32>
    %330 = arith.mulf %325, %329 : vector<8x128xf32>
    %331 = arith.subf %328, %330 : vector<8x128xf32>
    %cst_115 = arith.constant 1.000000e+00 : f32
    %332 = vector.broadcast %cst_115 : f32 to vector<8x128xf32>
    %333 = arith.cmpf ogt, %331, %332 : vector<8x128xf32>
    %334 = arith.extui %333 : vector<8x128xi1> to vector<8x128xi32>
    %335 = arith.sitofp %334 : vector<8x128xi32> to vector<8x128xf32>
    %c168 = arith.constant 168 : index
    %c0_116 = arith.constant 0 : index
    %336 = vector.load %arg7[%c168, %c0_116] : memref<200x128xf32, #tpu.memory_space<vmem>>, vector<8x128xf32>
    tpu.vector_store %arg7[%c168, %c0_116], %335 {strides = array<i32>} : memref<200x128xf32, #tpu.memory_space<vmem>>, vector<8x128xf32>,
    %cst_117 = arith.constant 1.000000e+00 : f32
    %337 = vector.broadcast %cst_117 : f32 to vector<8x128xf32>
    %338 = arith.cmpf ogt, %331, %337 : vector<8x128xf32>
    %339 = arith.extui %338 : vector<8x128xi1> to vector<8x128xi32>
    %340 = arith.sitofp %339 : vector<8x128xi32> to vector<8x128xf32>
    %cst_118 = arith.constant 0.899999976 : f32
    %341 = vector.broadcast %cst_118 : f32 to vector<8x128xf32>
    %342 = arith.mulf %341, %331 : vector<8x128xf32>
    %343 = arith.addf %342, %5 : vector<8x128xf32>
    %cst_119 = arith.constant 1.000000e+00 : f32
    %344 = vector.broadcast %cst_119 : f32 to vector<8x128xf32>
    %345 = arith.mulf %340, %344 : vector<8x128xf32>
    %346 = arith.subf %343, %345 : vector<8x128xf32>
    %cst_120 = arith.constant 1.000000e+00 : f32
    %347 = vector.broadcast %cst_120 : f32 to vector<8x128xf32>
    %348 = arith.cmpf ogt, %346, %347 : vector<8x128xf32>
    %349 = arith.extui %348 : vector<8x128xi1> to vector<8x128xi32>
    %350 = arith.sitofp %349 : vector<8x128xi32> to vector<8x128xf32>
    %c176 = arith.constant 176 : index
    %c0_121 = arith.constant 0 : index
    %351 = vector.load %arg7[%c176, %c0_121] : memref<200x128xf32, #tpu.memory_space<vmem>>, vector<8x128xf32>
    tpu.vector_store %arg7[%c176, %c0_121], %350 {strides = array<i32>} : memref<200x128xf32, #tpu.memory_space<vmem>>, vector<8x128xf32>,
    %cst_122 = arith.constant 1.000000e+00 : f32
    %352 = vector.broadcast %cst_122 : f32 to vector<8x128xf32>
    %353 = arith.cmpf ogt, %346, %352 : vector<8x128xf32>
    %354 = arith.extui %353 : vector<8x128xi1> to vector<8x128xi32>
    %355 = arith.sitofp %354 : vector<8x128xi32> to vector<8x128xf32>
    %cst_123 = arith.constant 0.899999976 : f32
    %356 = vector.broadcast %cst_123 : f32 to vector<8x128xf32>
    %357 = arith.mulf %356, %346 : vector<8x128xf32>
    %358 = arith.addf %357, %5 : vector<8x128xf32>
    %cst_124 = arith.constant 1.000000e+00 : f32
    %359 = vector.broadcast %cst_124 : f32 to vector<8x128xf32>
    %360 = arith.mulf %355, %359 : vector<8x128xf32>
    %361 = arith.subf %358, %360 : vector<8x128xf32>
    %cst_125 = arith.constant 1.000000e+00 : f32
    %362 = vector.broadcast %cst_125 : f32 to vector<8x128xf32>
    %363 = arith.cmpf ogt, %361, %362 : vector<8x128xf32>
    %364 = arith.extui %363 : vector<8x128xi1> to vector<8x128xi32>
    %365 = arith.sitofp %364 : vector<8x128xi32> to vector<8x128xf32>
    %c184 = arith.constant 184 : index
    %c0_126 = arith.constant 0 : index
    %366 = vector.load %arg7[%c184, %c0_126] : memref<200x128xf32, #tpu.memory_space<vmem>>, vector<8x128xf32>
    tpu.vector_store %arg7[%c184, %c0_126], %365 {strides = array<i32>} : memref<200x128xf32, #tpu.memory_space<vmem>>, vector<8x128xf32>,
    %cst_127 = arith.constant 1.000000e+00 : f32
    %367 = vector.broadcast %cst_127 : f32 to vector<8x128xf32>
    %368 = arith.cmpf ogt, %361, %367 : vector<8x128xf32>
    %369 = arith.extui %368 : vector<8x128xi1> to vector<8x128xi32>
    %370 = arith.sitofp %369 : vector<8x128xi32> to vector<8x128xf32>
    %cst_128 = arith.constant 0.899999976 : f32
    %371 = vector.broadcast %cst_128 : f32 to vector<8x128xf32>
    %372 = arith.mulf %371, %361 : vector<8x128xf32>
    %373 = arith.addf %372, %5 : vector<8x128xf32>
    %cst_129 = arith.constant 1.000000e+00 : f32
    %374 = vector.broadcast %cst_129 : f32 to vector<8x128xf32>
    %375 = arith.mulf %370, %374 : vector<8x128xf32>
    %376 = arith.subf %373, %375 : vector<8x128xf32>
    %cst_130 = arith.constant 1.000000e+00 : f32
    %377 = vector.broadcast %cst_130 : f32 to vector<8x128xf32>
    %378 = arith.cmpf ogt, %376, %377 : vector<8x128xf32>
    %379 = arith.extui %378 : vector<8x128xi1> to vector<8x128xi32>
    %380 = arith.sitofp %379 : vector<8x128xi32> to vector<8x128xf32>
    %c192 = arith.constant 192 : index
    %c0_131 = arith.constant 0 : index
    %381 = vector.load %arg7[%c192, %c0_131] : memref<200x128xf32, #tpu.memory_space<vmem>>, vector<8x128xf32>
    tpu.vector_store %arg7[%c192, %c0_131], %380 {strides = array<i32>} : memref<200x128xf32, #tpu.memory_space<vmem>>, vector<8x128xf32>,
    %cst_132 = arith.constant 0.000000e+00 : f32
    %382 = vector.broadcast %cst_132 : f32 to vector<8x128xf32>
    %c0_133 = arith.constant 0 : index
    %c0_134 = arith.constant 0 : index
    %383 = vector.load %arg6[%c0_133, %c0_134] : memref<8x128xf32, #tpu.memory_space<vmem>>, vector<8x128xf32>
    tpu.vector_store %arg6[%c0_133, %c0_134], %382 {strides = array<i32>} : memref<8x128xf32, #tpu.memory_space<vmem>>, vector<8x128xf32>,
    %cst_135 = arith.constant 0.000000e+00 : f32
    %384 = vector.broadcast %cst_135 : f32 to vector<8x128xf32>
    %c0_136 = arith.constant 0 : index
    %c0_137 = arith.constant 0 : index
    %385 = vector.load %arg7[%c0_136, %c0_137] : memref<200x128xf32, #tpu.memory_space<vmem>>, vector<40x128xf32>
    %c0_138 = arith.constant 0 : index
    %c0_139 = arith.constant 0 : index
    %386 = vector.load %arg4[%c0_138, %c0_139] : memref<128x128xf32, #tpu.memory_space<vmem>>, vector<128x128xf32>
    %cst_140 = arith.constant dense<0.000000e+00> : vector<40x128xf32>
    %387 = tpu.matmul %385, %386, %cst_140 {dimension_numbers = #tpu.dot_dimension_numbers<[1], [0], [0], [1], [0, 0, 1, 1], [], []>} : vector<40x128xf32>, vector<128x128xf32>, vector<40x128xf32> -> vector<40x128xf32>
    %c0_141 = arith.constant 0 : index
    %c0_142 = arith.constant 0 : index
    %388 = vector.load %arg5[%c0_141, %c0_142] : memref<1x128xf32, #tpu.memory_space<vmem>>, vector<1x128xf32>
    %389 = vector.broadcast %388 : vector<1x128xf32> to vector<40x128xf32>
    %390 = arith.addf %387, %389 : vector<40x128xf32>
    %391 = vector.extract_strided_slice %390 {offsets = [0, 0], sizes = [8, 128], strides = [1, 1]} : vector<40x128xf32> to vector<8x128xf32>
    %cst_143 = arith.constant 1.000000e+00 : f32
    %392 = vector.broadcast %cst_143 : f32 to vector<8x128xf32>
    %393 = arith.cmpf ogt, %384, %392 : vector<8x128xf32>
    %394 = arith.extui %393 : vector<8x128xi1> to vector<8x128xi32>
    %395 = arith.sitofp %394 : vector<8x128xi32> to vector<8x128xf32>
    %cst_144 = arith.constant 0.899999976 : f32
    %396 = vector.broadcast %cst_144 : f32 to vector<8x128xf32>
    %397 = arith.mulf %396, %384 : vector<8x128xf32>
    %398 = arith.addf %397, %391 : vector<8x128xf32>
    %cst_145 = arith.constant 1.000000e+00 : f32
    %399 = vector.broadcast %cst_145 : f32 to vector<8x128xf32>
    %400 = arith.mulf %395, %399 : vector<8x128xf32>
    %401 = arith.subf %398, %400 : vector<8x128xf32>
    %cst_146 = arith.constant 1.000000e+00 : f32
    %402 = vector.broadcast %cst_146 : f32 to vector<8x128xf32>
    %403 = arith.cmpf ogt, %401, %402 : vector<8x128xf32>
    %404 = arith.extui %403 : vector<8x128xi1> to vector<8x128xi32>
    %405 = arith.sitofp %404 : vector<8x128xi32> to vector<8x128xf32>
    %c0_147 = arith.constant 0 : index
    %c0_148 = arith.constant 0 : index
    %406 = vector.load %arg6[%c0_147, %c0_148] : memref<8x128xf32, #tpu.memory_space<vmem>>, vector<8x128xf32>
    %407 = arith.addf %406, %405 : vector<8x128xf32>
    %c0_149 = arith.constant 0 : index
    %c0_150 = arith.constant 0 : index
    %408 = vector.load %arg6[%c0_149, %c0_150] : memref<8x128xf32, #tpu.memory_space<vmem>>, vector<8x128xf32>
    tpu.vector_store %arg6[%c0_149, %c0_150], %407 {strides = array<i32>} : memref<8x128xf32, #tpu.memory_space<vmem>>, vector<8x128xf32>,
    %409 = vector.extract_strided_slice %390 {offsets = [8, 0], sizes = [8, 128], strides = [1, 1]} : vector<40x128xf32> to vector<8x128xf32>
    %cst_151 = arith.constant 1.000000e+00 : f32
    %410 = vector.broadcast %cst_151 : f32 to vector<8x128xf32>
    %411 = arith.cmpf ogt, %401, %410 : vector<8x128xf32>
    %412 = arith.extui %411 : vector<8x128xi1> to vector<8x128xi32>
    %413 = arith.sitofp %412 : vector<8x128xi32> to vector<8x128xf32>
    %cst_152 = arith.constant 0.899999976 : f32
    %414 = vector.broadcast %cst_152 : f32 to vector<8x128xf32>
    %415 = arith.mulf %414, %401 : vector<8x128xf32>
    %416 = arith.addf %415, %409 : vector<8x128xf32>
    %cst_153 = arith.constant 1.000000e+00 : f32
    %417 = vector.broadcast %cst_153 : f32 to vector<8x128xf32>
    %418 = arith.mulf %413, %417 : vector<8x128xf32>
    %419 = arith.subf %416, %418 : vector<8x128xf32>
    %cst_154 = arith.constant 1.000000e+00 : f32
    %420 = vector.broadcast %cst_154 : f32 to vector<8x128xf32>
    %421 = arith.cmpf ogt, %419, %420 : vector<8x128xf32>
    %422 = arith.extui %421 : vector<8x128xi1> to vector<8x128xi32>
    %423 = arith.sitofp %422 : vector<8x128xi32> to vector<8x128xf32>
    %c2_i32 = arith.constant 2 : i32
    %424 = tpu.dynamic_rotate %423 by %c2_i32 dim 1 : vector<8x128xf32>, i32 -> vector<8x128xf32>
    %c0_155 = arith.constant 0 : index
    %c0_156 = arith.constant 0 : index
    %425 = vector.load %arg6[%c0_155, %c0_156] : memref<8x128xf32, #tpu.memory_space<vmem>>, vector<8x128xf32>
    %426 = arith.addf %425, %424 : vector<8x128xf32>
    %c0_157 = arith.constant 0 : index
    %c0_158 = arith.constant 0 : index
    %427 = vector.load %arg6[%c0_157, %c0_158] : memref<8x128xf32, #tpu.memory_space<vmem>>, vector<8x128xf32>
    tpu.vector_store %arg6[%c0_157, %c0_158], %426 {strides = array<i32>} : memref<8x128xf32, #tpu.memory_space<vmem>>, vector<8x128xf32>,
    %428 = vector.extract_strided_slice %390 {offsets = [16, 0], sizes = [8, 128], strides = [1, 1]} : vector<40x128xf32> to vector<8x128xf32>
    %cst_159 = arith.constant 1.000000e+00 : f32
    %429 = vector.broadcast %cst_159 : f32 to vector<8x128xf32>
    %430 = arith.cmpf ogt, %419, %429 : vector<8x128xf32>
    %431 = arith.extui %430 : vector<8x128xi1> to vector<8x128xi32>
    %432 = arith.sitofp %431 : vector<8x128xi32> to vector<8x128xf32>
    %cst_160 = arith.constant 0.899999976 : f32
    %433 = vector.broadcast %cst_160 : f32 to vector<8x128xf32>
    %434 = arith.mulf %433, %419 : vector<8x128xf32>
    %435 = arith.addf %434, %428 : vector<8x128xf32>
    %cst_161 = arith.constant 1.000000e+00 : f32
    %436 = vector.broadcast %cst_161 : f32 to vector<8x128xf32>
    %437 = arith.mulf %432, %436 : vector<8x128xf32>
    %438 = arith.subf %435, %437 : vector<8x128xf32>
    %cst_162 = arith.constant 1.000000e+00 : f32
    %439 = vector.broadcast %cst_162 : f32 to vector<8x128xf32>
    %440 = arith.cmpf ogt, %438, %439 : vector<8x128xf32>
    %441 = arith.extui %440 : vector<8x128xi1> to vector<8x128xi32>
    %442 = arith.sitofp %441 : vector<8x128xi32> to vector<8x128xf32>
    %c4_i32 = arith.constant 4 : i32
    %443 = tpu.dynamic_rotate %442 by %c4_i32 dim 1 : vector<8x128xf32>, i32 -> vector<8x128xf32>
    %c0_163 = arith.constant 0 : index
    %c0_164 = arith.constant 0 : index
    %444 = vector.load %arg6[%c0_163, %c0_164] : memref<8x128xf32, #tpu.memory_space<vmem>>, vector<8x128xf32>
    %445 = arith.addf %444, %443 : vector<8x128xf32>
    %c0_165 = arith.constant 0 : index
    %c0_166 = arith.constant 0 : index
    %446 = vector.load %arg6[%c0_165, %c0_166] : memref<8x128xf32, #tpu.memory_space<vmem>>, vector<8x128xf32>
    tpu.vector_store %arg6[%c0_165, %c0_166], %445 {strides = array<i32>} : memref<8x128xf32, #tpu.memory_space<vmem>>, vector<8x128xf32>,
    %447 = vector.extract_strided_slice %390 {offsets = [24, 0], sizes = [8, 128], strides = [1, 1]} : vector<40x128xf32> to vector<8x128xf32>
    %cst_167 = arith.constant 1.000000e+00 : f32
    %448 = vector.broadcast %cst_167 : f32 to vector<8x128xf32>
    %449 = arith.cmpf ogt, %438, %448 : vector<8x128xf32>
    %450 = arith.extui %449 : vector<8x128xi1> to vector<8x128xi32>
    %451 = arith.sitofp %450 : vector<8x128xi32> to vector<8x128xf32>
    %cst_168 = arith.constant 0.899999976 : f32
    %452 = vector.broadcast %cst_168 : f32 to vector<8x128xf32>
    %453 = arith.mulf %452, %438 : vector<8x128xf32>
    %454 = arith.addf %453, %447 : vector<8x128xf32>
    %cst_169 = arith.constant 1.000000e+00 : f32
    %455 = vector.broadcast %cst_169 : f32 to vector<8x128xf32>
    %456 = arith.mulf %451, %455 : vector<8x128xf32>
    %457 = arith.subf %454, %456 : vector<8x128xf32>
    %cst_170 = arith.constant 1.000000e+00 : f32
    %458 = vector.broadcast %cst_170 : f32 to vector<8x128xf32>
    %459 = arith.cmpf ogt, %457, %458 : vector<8x128xf32>
    %460 = arith.extui %459 : vector<8x128xi1> to vector<8x128xi32>
    %461 = arith.sitofp %460 : vector<8x128xi32> to vector<8x128xf32>
    %c6_i32 = arith.constant 6 : i32
    %462 = tpu.dynamic_rotate %461 by %c6_i32 dim 1 : vector<8x128xf32>, i32 -> vector<8x128xf32>
    %c0_171 = arith.constant 0 : index
    %c0_172 = arith.constant 0 : index
    %463 = vector.load %arg6[%c0_171, %c0_172] : memref<8x128xf32, #tpu.memory_space<vmem>>, vector<8x128xf32>
    %464 = arith.addf %463, %462 : vector<8x128xf32>
    %c0_173 = arith.constant 0 : index
    %c0_174 = arith.constant 0 : index
    %465 = vector.load %arg6[%c0_173, %c0_174] : memref<8x128xf32, #tpu.memory_space<vmem>>, vector<8x128xf32>
    tpu.vector_store %arg6[%c0_173, %c0_174], %464 {strides = array<i32>} : memref<8x128xf32, #tpu.memory_space<vmem>>, vector<8x128xf32>,
    %466 = vector.extract_strided_slice %390 {offsets = [32, 0], sizes = [8, 128], strides = [1, 1]} : vector<40x128xf32> to vector<8x128xf32>
    %cst_175 = arith.constant 1.000000e+00 : f32
    %467 = vector.broadcast %cst_175 : f32 to vector<8x128xf32>
    %468 = arith.cmpf ogt, %457, %467 : vector<8x128xf32>
    %469 = arith.extui %468 : vector<8x128xi1> to vector<8x128xi32>
    %470 = arith.sitofp %469 : vector<8x128xi32> to vector<8x128xf32>
    %cst_176 = arith.constant 0.899999976 : f32
    %471 = vector.broadcast %cst_176 : f32 to vector<8x128xf32>
    %472 = arith.mulf %471, %457 : vector<8x128xf32>
    %473 = arith.addf %472, %466 : vector<8x128xf32>
    %cst_177 = arith.constant 1.000000e+00 : f32
    %474 = vector.broadcast %cst_177 : f32 to vector<8x128xf32>
    %475 = arith.mulf %470, %474 : vector<8x128xf32>
    %476 = arith.subf %473, %475 : vector<8x128xf32>
    %cst_178 = arith.constant 1.000000e+00 : f32
    %477 = vector.broadcast %cst_178 : f32 to vector<8x128xf32>
    %478 = arith.cmpf ogt, %476, %477 : vector<8x128xf32>
    %479 = arith.extui %478 : vector<8x128xi1> to vector<8x128xi32>
    %480 = arith.sitofp %479 : vector<8x128xi32> to vector<8x128xf32>
    %c8_i32 = arith.constant 8 : i32
    %481 = tpu.dynamic_rotate %480 by %c8_i32 dim 1 : vector<8x128xf32>, i32 -> vector<8x128xf32>
    %c0_179 = arith.constant 0 : index
    %c0_180 = arith.constant 0 : index
    %482 = vector.load %arg6[%c0_179, %c0_180] : memref<8x128xf32, #tpu.memory_space<vmem>>, vector<8x128xf32>
    %483 = arith.addf %482, %481 : vector<8x128xf32>
    %c0_181 = arith.constant 0 : index
    %c0_182 = arith.constant 0 : index
    %484 = vector.load %arg6[%c0_181, %c0_182] : memref<8x128xf32, #tpu.memory_space<vmem>>, vector<8x128xf32>
    tpu.vector_store %arg6[%c0_181, %c0_182], %483 {strides = array<i32>} : memref<8x128xf32, #tpu.memory_space<vmem>>, vector<8x128xf32>,
    %c40_183 = arith.constant 40 : index
    %c0_184 = arith.constant 0 : index
    %485 = vector.load %arg7[%c40_183, %c0_184] : memref<200x128xf32, #tpu.memory_space<vmem>>, vector<40x128xf32>
    %c0_185 = arith.constant 0 : index
    %c0_186 = arith.constant 0 : index
    %486 = vector.load %arg4[%c0_185, %c0_186] : memref<128x128xf32, #tpu.memory_space<vmem>>, vector<128x128xf32>
    %cst_187 = arith.constant dense<0.000000e+00> : vector<40x128xf32>
    %487 = tpu.matmul %485, %486, %cst_187 {dimension_numbers = #tpu.dot_dimension_numbers<[1], [0], [0], [1], [0, 0, 1, 1], [], []>} : vector<40x128xf32>, vector<128x128xf32>, vector<40x128xf32> -> vector<40x128xf32>
    %c0_188 = arith.constant 0 : index
    %c0_189 = arith.constant 0 : index
    %488 = vector.load %arg5[%c0_188, %c0_189] : memref<1x128xf32, #tpu.memory_space<vmem>>, vector<1x128xf32>
    %489 = vector.broadcast %488 : vector<1x128xf32> to vector<40x128xf32>
    %490 = arith.addf %487, %489 : vector<40x128xf32>
    %491 = vector.extract_strided_slice %490 {offsets = [0, 0], sizes = [8, 128], strides = [1, 1]} : vector<40x128xf32> to vector<8x128xf32>
    %cst_190 = arith.constant 1.000000e+00 : f32
    %492 = vector.broadcast %cst_190 : f32 to vector<8x128xf32>
    %493 = arith.cmpf ogt, %476, %492 : vector<8x128xf32>
    %494 = arith.extui %493 : vector<8x128xi1> to vector<8x128xi32>
    %495 = arith.sitofp %494 : vector<8x128xi32> to vector<8x128xf32>
    %cst_191 = arith.constant 0.899999976 : f32
    %496 = vector.broadcast %cst_191 : f32 to vector<8x128xf32>
    %497 = arith.mulf %496, %476 : vector<8x128xf32>
    %498 = arith.addf %497, %491 : vector<8x128xf32>
    %cst_192 = arith.constant 1.000000e+00 : f32
    %499 = vector.broadcast %cst_192 : f32 to vector<8x128xf32>
    %500 = arith.mulf %495, %499 : vector<8x128xf32>
    %501 = arith.subf %498, %500 : vector<8x128xf32>
    %cst_193 = arith.constant 1.000000e+00 : f32
    %502 = vector.broadcast %cst_193 : f32 to vector<8x128xf32>
    %503 = arith.cmpf ogt, %501, %502 : vector<8x128xf32>
    %504 = arith.extui %503 : vector<8x128xi1> to vector<8x128xi32>
    %505 = arith.sitofp %504 : vector<8x128xi32> to vector<8x128xf32>
    %c10_i32 = arith.constant 10 : i32
    %506 = tpu.dynamic_rotate %505 by %c10_i32 dim 1 : vector<8x128xf32>, i32 -> vector<8x128xf32>
    %c0_194 = arith.constant 0 : index
    %c0_195 = arith.constant 0 : index
    %507 = vector.load %arg6[%c0_194, %c0_195] : memref<8x128xf32, #tpu.memory_space<vmem>>, vector<8x128xf32>
    %508 = arith.addf %507, %506 : vector<8x128xf32>
    %c0_196 = arith.constant 0 : index
    %c0_197 = arith.constant 0 : index
    %509 = vector.load %arg6[%c0_196, %c0_197] : memref<8x128xf32, #tpu.memory_space<vmem>>, vector<8x128xf32>
    tpu.vector_store %arg6[%c0_196, %c0_197], %508 {strides = array<i32>} : memref<8x128xf32, #tpu.memory_space<vmem>>, vector<8x128xf32>,
    %510 = vector.extract_strided_slice %490 {offsets = [8, 0], sizes = [8, 128], strides = [1, 1]} : vector<40x128xf32> to vector<8x128xf32>
    %cst_198 = arith.constant 1.000000e+00 : f32
    %511 = vector.broadcast %cst_198 : f32 to vector<8x128xf32>
    %512 = arith.cmpf ogt, %501, %511 : vector<8x128xf32>
    %513 = arith.extui %512 : vector<8x128xi1> to vector<8x128xi32>
    %514 = arith.sitofp %513 : vector<8x128xi32> to vector<8x128xf32>
    %cst_199 = arith.constant 0.899999976 : f32
    %515 = vector.broadcast %cst_199 : f32 to vector<8x128xf32>
    %516 = arith.mulf %515, %501 : vector<8x128xf32>
    %517 = arith.addf %516, %510 : vector<8x128xf32>
    %cst_200 = arith.constant 1.000000e+00 : f32
    %518 = vector.broadcast %cst_200 : f32 to vector<8x128xf32>
    %519 = arith.mulf %514, %518 : vector<8x128xf32>
    %520 = arith.subf %517, %519 : vector<8x128xf32>
    %cst_201 = arith.constant 1.000000e+00 : f32
    %521 = vector.broadcast %cst_201 : f32 to vector<8x128xf32>
    %522 = arith.cmpf ogt, %520, %521 : vector<8x128xf32>
    %523 = arith.extui %522 : vector<8x128xi1> to vector<8x128xi32>
    %524 = arith.sitofp %523 : vector<8x128xi32> to vector<8x128xf32>
    %c12_i32 = arith.constant 12 : i32
    %525 = tpu.dynamic_rotate %524 by %c12_i32 dim 1 : vector<8x128xf32>, i32 -> vector<8x128xf32>
    %c0_202 = arith.constant 0 : index
    %c0_203 = arith.constant 0 : index
    %526 = vector.load %arg6[%c0_202, %c0_203] : memref<8x128xf32, #tpu.memory_space<vmem>>, vector<8x128xf32>
    %527 = arith.addf %526, %525 : vector<8x128xf32>
    %c0_204 = arith.constant 0 : index
    %c0_205 = arith.constant 0 : index
    %528 = vector.load %arg6[%c0_204, %c0_205] : memref<8x128xf32, #tpu.memory_space<vmem>>, vector<8x128xf32>
    tpu.vector_store %arg6[%c0_204, %c0_205], %527 {strides = array<i32>} : memref<8x128xf32, #tpu.memory_space<vmem>>, vector<8x128xf32>,
    %529 = vector.extract_strided_slice %490 {offsets = [16, 0], sizes = [8, 128], strides = [1, 1]} : vector<40x128xf32> to vector<8x128xf32>
    %cst_206 = arith.constant 1.000000e+00 : f32
    %530 = vector.broadcast %cst_206 : f32 to vector<8x128xf32>
    %531 = arith.cmpf ogt, %520, %530 : vector<8x128xf32>
    %532 = arith.extui %531 : vector<8x128xi1> to vector<8x128xi32>
    %533 = arith.sitofp %532 : vector<8x128xi32> to vector<8x128xf32>
    %cst_207 = arith.constant 0.899999976 : f32
    %534 = vector.broadcast %cst_207 : f32 to vector<8x128xf32>
    %535 = arith.mulf %534, %520 : vector<8x128xf32>
    %536 = arith.addf %535, %529 : vector<8x128xf32>
    %cst_208 = arith.constant 1.000000e+00 : f32
    %537 = vector.broadcast %cst_208 : f32 to vector<8x128xf32>
    %538 = arith.mulf %533, %537 : vector<8x128xf32>
    %539 = arith.subf %536, %538 : vector<8x128xf32>
    %cst_209 = arith.constant 1.000000e+00 : f32
    %540 = vector.broadcast %cst_209 : f32 to vector<8x128xf32>
    %541 = arith.cmpf ogt, %539, %540 : vector<8x128xf32>
    %542 = arith.extui %541 : vector<8x128xi1> to vector<8x128xi32>
    %543 = arith.sitofp %542 : vector<8x128xi32> to vector<8x128xf32>
    %c14_i32 = arith.constant 14 : i32
    %544 = tpu.dynamic_rotate %543 by %c14_i32 dim 1 : vector<8x128xf32>, i32 -> vector<8x128xf32>
    %c0_210 = arith.constant 0 : index
    %c0_211 = arith.constant 0 : index
    %545 = vector.load %arg6[%c0_210, %c0_211] : memref<8x128xf32, #tpu.memory_space<vmem>>, vector<8x128xf32>
    %546 = arith.addf %545, %544 : vector<8x128xf32>
    %c0_212 = arith.constant 0 : index
    %c0_213 = arith.constant 0 : index
    %547 = vector.load %arg6[%c0_212, %c0_213] : memref<8x128xf32, #tpu.memory_space<vmem>>, vector<8x128xf32>
    tpu.vector_store %arg6[%c0_212, %c0_213], %546 {strides = array<i32>} : memref<8x128xf32, #tpu.memory_space<vmem>>, vector<8x128xf32>,
    %548 = vector.extract_strided_slice %490 {offsets = [24, 0], sizes = [8, 128], strides = [1, 1]} : vector<40x128xf32> to vector<8x128xf32>
    %cst_214 = arith.constant 1.000000e+00 : f32
    %549 = vector.broadcast %cst_214 : f32 to vector<8x128xf32>
    %550 = arith.cmpf ogt, %539, %549 : vector<8x128xf32>
    %551 = arith.extui %550 : vector<8x128xi1> to vector<8x128xi32>
    %552 = arith.sitofp %551 : vector<8x128xi32> to vector<8x128xf32>
    %cst_215 = arith.constant 0.899999976 : f32
    %553 = vector.broadcast %cst_215 : f32 to vector<8x128xf32>
    %554 = arith.mulf %553, %539 : vector<8x128xf32>
    %555 = arith.addf %554, %548 : vector<8x128xf32>
    %cst_216 = arith.constant 1.000000e+00 : f32
    %556 = vector.broadcast %cst_216 : f32 to vector<8x128xf32>
    %557 = arith.mulf %552, %556 : vector<8x128xf32>
    %558 = arith.subf %555, %557 : vector<8x128xf32>
    %cst_217 = arith.constant 1.000000e+00 : f32
    %559 = vector.broadcast %cst_217 : f32 to vector<8x128xf32>
    %560 = arith.cmpf ogt, %558, %559 : vector<8x128xf32>
    %561 = arith.extui %560 : vector<8x128xi1> to vector<8x128xi32>
    %562 = arith.sitofp %561 : vector<8x128xi32> to vector<8x128xf32>
    %c16_i32 = arith.constant 16 : i32
    %563 = tpu.dynamic_rotate %562 by %c16_i32 dim 1 : vector<8x128xf32>, i32 -> vector<8x128xf32>
    %c0_218 = arith.constant 0 : index
    %c0_219 = arith.constant 0 : index
    %564 = vector.load %arg6[%c0_218, %c0_219] : memref<8x128xf32, #tpu.memory_space<vmem>>, vector<8x128xf32>
    %565 = arith.addf %564, %563 : vector<8x128xf32>
    %c0_220 = arith.constant 0 : index
    %c0_221 = arith.constant 0 : index
    %566 = vector.load %arg6[%c0_220, %c0_221] : memref<8x128xf32, #tpu.memory_space<vmem>>, vector<8x128xf32>
    tpu.vector_store %arg6[%c0_220, %c0_221], %565 {strides = array<i32>} : memref<8x128xf32, #tpu.memory_space<vmem>>, vector<8x128xf32>,
    %567 = vector.extract_strided_slice %490 {offsets = [32, 0], sizes = [8, 128], strides = [1, 1]} : vector<40x128xf32> to vector<8x128xf32>
    %cst_222 = arith.constant 1.000000e+00 : f32
    %568 = vector.broadcast %cst_222 : f32 to vector<8x128xf32>
    %569 = arith.cmpf ogt, %558, %568 : vector<8x128xf32>
    %570 = arith.extui %569 : vector<8x128xi1> to vector<8x128xi32>
    %571 = arith.sitofp %570 : vector<8x128xi32> to vector<8x128xf32>
    %cst_223 = arith.constant 0.899999976 : f32
    %572 = vector.broadcast %cst_223 : f32 to vector<8x128xf32>
    %573 = arith.mulf %572, %558 : vector<8x128xf32>
    %574 = arith.addf %573, %567 : vector<8x128xf32>
    %cst_224 = arith.constant 1.000000e+00 : f32
    %575 = vector.broadcast %cst_224 : f32 to vector<8x128xf32>
    %576 = arith.mulf %571, %575 : vector<8x128xf32>
    %577 = arith.subf %574, %576 : vector<8x128xf32>
    %cst_225 = arith.constant 1.000000e+00 : f32
    %578 = vector.broadcast %cst_225 : f32 to vector<8x128xf32>
    %579 = arith.cmpf ogt, %577, %578 : vector<8x128xf32>
    %580 = arith.extui %579 : vector<8x128xi1> to vector<8x128xi32>
    %581 = arith.sitofp %580 : vector<8x128xi32> to vector<8x128xf32>
    %c18_i32 = arith.constant 18 : i32
    %582 = tpu.dynamic_rotate %581 by %c18_i32 dim 1 : vector<8x128xf32>, i32 -> vector<8x128xf32>
    %c0_226 = arith.constant 0 : index
    %c0_227 = arith.constant 0 : index
    %583 = vector.load %arg6[%c0_226, %c0_227] : memref<8x128xf32, #tpu.memory_space<vmem>>, vector<8x128xf32>
    %584 = arith.addf %583, %582 : vector<8x128xf32>
    %c0_228 = arith.constant 0 : index
    %c0_229 = arith.constant 0 : index
    %585 = vector.load %arg6[%c0_228, %c0_229] : memref<8x128xf32, #tpu.memory_space<vmem>>, vector<8x128xf32>
    tpu.vector_store %arg6[%c0_228, %c0_229], %584 {strides = array<i32>} : memref<8x128xf32, #tpu.memory_space<vmem>>, vector<8x128xf32>,
    %c80_230 = arith.constant 80 : index
    %c0_231 = arith.constant 0 : index
    %586 = vector.load %arg7[%c80_230, %c0_231] : memref<200x128xf32, #tpu.memory_space<vmem>>, vector<40x128xf32>
    %c0_232 = arith.constant 0 : index
    %c0_233 = arith.constant 0 : index
    %587 = vector.load %arg4[%c0_232, %c0_233] : memref<128x128xf32, #tpu.memory_space<vmem>>, vector<128x128xf32>
    %cst_234 = arith.constant dense<0.000000e+00> : vector<40x128xf32>
    %588 = tpu.matmul %586, %587, %cst_234 {dimension_numbers = #tpu.dot_dimension_numbers<[1], [0], [0], [1], [0, 0, 1, 1], [], []>} : vector<40x128xf32>, vector<128x128xf32>, vector<40x128xf32> -> vector<40x128xf32>
    %c0_235 = arith.constant 0 : index
    %c0_236 = arith.constant 0 : index
    %589 = vector.load %arg5[%c0_235, %c0_236] : memref<1x128xf32, #tpu.memory_space<vmem>>, vector<1x128xf32>
    %590 = vector.broadcast %589 : vector<1x128xf32> to vector<40x128xf32>
    %591 = arith.addf %588, %590 : vector<40x128xf32>
    %592 = vector.extract_strided_slice %591 {offsets = [0, 0], sizes = [8, 128], strides = [1, 1]} : vector<40x128xf32> to vector<8x128xf32>
    %cst_237 = arith.constant 1.000000e+00 : f32
    %593 = vector.broadcast %cst_237 : f32 to vector<8x128xf32>
    %594 = arith.cmpf ogt, %577, %593 : vector<8x128xf32>
    %595 = arith.extui %594 : vector<8x128xi1> to vector<8x128xi32>
    %596 = arith.sitofp %595 : vector<8x128xi32> to vector<8x128xf32>
    %cst_238 = arith.constant 0.899999976 : f32
    %597 = vector.broadcast %cst_238 : f32 to vector<8x128xf32>
    %598 = arith.mulf %597, %577 : vector<8x128xf32>
    %599 = arith.addf %598, %592 : vector<8x128xf32>
    %cst_239 = arith.constant 1.000000e+00 : f32
    %600 = vector.broadcast %cst_239 : f32 to vector<8x128xf32>
    %601 = arith.mulf %596, %600 : vector<8x128xf32>
    %602 = arith.subf %599, %601 : vector<8x128xf32>
    %cst_240 = arith.constant 1.000000e+00 : f32
    %603 = vector.broadcast %cst_240 : f32 to vector<8x128xf32>
    %604 = arith.cmpf ogt, %602, %603 : vector<8x128xf32>
    %605 = arith.extui %604 : vector<8x128xi1> to vector<8x128xi32>
    %606 = arith.sitofp %605 : vector<8x128xi32> to vector<8x128xf32>
    %c20_i32 = arith.constant 20 : i32
    %607 = tpu.dynamic_rotate %606 by %c20_i32 dim 1 : vector<8x128xf32>, i32 -> vector<8x128xf32>
    %c0_241 = arith.constant 0 : index
    %c0_242 = arith.constant 0 : index
    %608 = vector.load %arg6[%c0_241, %c0_242] : memref<8x128xf32, #tpu.memory_space<vmem>>, vector<8x128xf32>
    %609 = arith.addf %608, %607 : vector<8x128xf32>
    %c0_243 = arith.constant 0 : index
    %c0_244 = arith.constant 0 : index
    %610 = vector.load %arg6[%c0_243, %c0_244] : memref<8x128xf32, #tpu.memory_space<vmem>>, vector<8x128xf32>
    tpu.vector_store %arg6[%c0_243, %c0_244], %609 {strides = array<i32>} : memref<8x128xf32, #tpu.memory_space<vmem>>, vector<8x128xf32>,
    %611 = vector.extract_strided_slice %591 {offsets = [8, 0], sizes = [8, 128], strides = [1, 1]} : vector<40x128xf32> to vector<8x128xf32>
    %cst_245 = arith.constant 1.000000e+00 : f32
    %612 = vector.broadcast %cst_245 : f32 to vector<8x128xf32>
    %613 = arith.cmpf ogt, %602, %612 : vector<8x128xf32>
    %614 = arith.extui %613 : vector<8x128xi1> to vector<8x128xi32>
    %615 = arith.sitofp %614 : vector<8x128xi32> to vector<8x128xf32>
    %cst_246 = arith.constant 0.899999976 : f32
    %616 = vector.broadcast %cst_246 : f32 to vector<8x128xf32>
    %617 = arith.mulf %616, %602 : vector<8x128xf32>
    %618 = arith.addf %617, %611 : vector<8x128xf32>
    %cst_247 = arith.constant 1.000000e+00 : f32
    %619 = vector.broadcast %cst_247 : f32 to vector<8x128xf32>
    %620 = arith.mulf %615, %619 : vector<8x128xf32>
    %621 = arith.subf %618, %620 : vector<8x128xf32>
    %cst_248 = arith.constant 1.000000e+00 : f32
    %622 = vector.broadcast %cst_248 : f32 to vector<8x128xf32>
    %623 = arith.cmpf ogt, %621, %622 : vector<8x128xf32>
    %624 = arith.extui %623 : vector<8x128xi1> to vector<8x128xi32>
    %625 = arith.sitofp %624 : vector<8x128xi32> to vector<8x128xf32>
    %c22_i32 = arith.constant 22 : i32
    %626 = tpu.dynamic_rotate %625 by %c22_i32 dim 1 : vector<8x128xf32>, i32 -> vector<8x128xf32>
    %c0_249 = arith.constant 0 : index
    %c0_250 = arith.constant 0 : index
    %627 = vector.load %arg6[%c0_249, %c0_250] : memref<8x128xf32, #tpu.memory_space<vmem>>, vector<8x128xf32>
    %628 = arith.addf %627, %626 : vector<8x128xf32>
    %c0_251 = arith.constant 0 : index
    %c0_252 = arith.constant 0 : index
    %629 = vector.load %arg6[%c0_251, %c0_252] : memref<8x128xf32, #tpu.memory_space<vmem>>, vector<8x128xf32>
    tpu.vector_store %arg6[%c0_251, %c0_252], %628 {strides = array<i32>} : memref<8x128xf32, #tpu.memory_space<vmem>>, vector<8x128xf32>,
    %630 = vector.extract_strided_slice %591 {offsets = [16, 0], sizes = [8, 128], strides = [1, 1]} : vector<40x128xf32> to vector<8x128xf32>
    %cst_253 = arith.constant 1.000000e+00 : f32
    %631 = vector.broadcast %cst_253 : f32 to vector<8x128xf32>
    %632 = arith.cmpf ogt, %621, %631 : vector<8x128xf32>
    %633 = arith.extui %632 : vector<8x128xi1> to vector<8x128xi32>
    %634 = arith.sitofp %633 : vector<8x128xi32> to vector<8x128xf32>
    %cst_254 = arith.constant 0.899999976 : f32
    %635 = vector.broadcast %cst_254 : f32 to vector<8x128xf32>
    %636 = arith.mulf %635, %621 : vector<8x128xf32>
    %637 = arith.addf %636, %630 : vector<8x128xf32>
    %cst_255 = arith.constant 1.000000e+00 : f32
    %638 = vector.broadcast %cst_255 : f32 to vector<8x128xf32>
    %639 = arith.mulf %634, %638 : vector<8x128xf32>
    %640 = arith.subf %637, %639 : vector<8x128xf32>
    %cst_256 = arith.constant 1.000000e+00 : f32
    %641 = vector.broadcast %cst_256 : f32 to vector<8x128xf32>
    %642 = arith.cmpf ogt, %640, %641 : vector<8x128xf32>
    %643 = arith.extui %642 : vector<8x128xi1> to vector<8x128xi32>
    %644 = arith.sitofp %643 : vector<8x128xi32> to vector<8x128xf32>
    %c24_i32 = arith.constant 24 : i32
    %645 = tpu.dynamic_rotate %644 by %c24_i32 dim 1 : vector<8x128xf32>, i32 -> vector<8x128xf32>
    %c0_257 = arith.constant 0 : index
    %c0_258 = arith.constant 0 : index
    %646 = vector.load %arg6[%c0_257, %c0_258] : memref<8x128xf32, #tpu.memory_space<vmem>>, vector<8x128xf32>
    %647 = arith.addf %646, %645 : vector<8x128xf32>
    %c0_259 = arith.constant 0 : index
    %c0_260 = arith.constant 0 : index
    %648 = vector.load %arg6[%c0_259, %c0_260] : memref<8x128xf32, #tpu.memory_space<vmem>>, vector<8x128xf32>
    tpu.vector_store %arg6[%c0_259, %c0_260], %647 {strides = array<i32>} : memref<8x128xf32, #tpu.memory_space<vmem>>, vector<8x128xf32>,
    %649 = vector.extract_strided_slice %591 {offsets = [24, 0], sizes = [8, 128], strides = [1, 1]} : vector<40x128xf32> to vector<8x128xf32>
    %cst_261 = arith.constant 1.000000e+00 : f32
    %650 = vector.broadcast %cst_261 : f32 to vector<8x128xf32>
    %651 = arith.cmpf ogt, %640, %650 : vector<8x128xf32>
    %652 = arith.extui %651 : vector<8x128xi1> to vector<8x128xi32>
    %653 = arith.sitofp %652 : vector<8x128xi32> to vector<8x128xf32>
    %cst_262 = arith.constant 0.899999976 : f32
    %654 = vector.broadcast %cst_262 : f32 to vector<8x128xf32>
    %655 = arith.mulf %654, %640 : vector<8x128xf32>
    %656 = arith.addf %655, %649 : vector<8x128xf32>
    %cst_263 = arith.constant 1.000000e+00 : f32
    %657 = vector.broadcast %cst_263 : f32 to vector<8x128xf32>
    %658 = arith.mulf %653, %657 : vector<8x128xf32>
    %659 = arith.subf %656, %658 : vector<8x128xf32>
    %cst_264 = arith.constant 1.000000e+00 : f32
    %660 = vector.broadcast %cst_264 : f32 to vector<8x128xf32>
    %661 = arith.cmpf ogt, %659, %660 : vector<8x128xf32>
    %662 = arith.extui %661 : vector<8x128xi1> to vector<8x128xi32>
    %663 = arith.sitofp %662 : vector<8x128xi32> to vector<8x128xf32>
    %c26_i32 = arith.constant 26 : i32
    %664 = tpu.dynamic_rotate %663 by %c26_i32 dim 1 : vector<8x128xf32>, i32 -> vector<8x128xf32>
    %c0_265 = arith.constant 0 : index
    %c0_266 = arith.constant 0 : index
    %665 = vector.load %arg6[%c0_265, %c0_266] : memref<8x128xf32, #tpu.memory_space<vmem>>, vector<8x128xf32>
    %666 = arith.addf %665, %664 : vector<8x128xf32>
    %c0_267 = arith.constant 0 : index
    %c0_268 = arith.constant 0 : index
    %667 = vector.load %arg6[%c0_267, %c0_268] : memref<8x128xf32, #tpu.memory_space<vmem>>, vector<8x128xf32>
    tpu.vector_store %arg6[%c0_267, %c0_268], %666 {strides = array<i32>} : memref<8x128xf32, #tpu.memory_space<vmem>>, vector<8x128xf32>,
    %668 = vector.extract_strided_slice %591 {offsets = [32, 0], sizes = [8, 128], strides = [1, 1]} : vector<40x128xf32> to vector<8x128xf32>
    %cst_269 = arith.constant 1.000000e+00 : f32
    %669 = vector.broadcast %cst_269 : f32 to vector<8x128xf32>
    %670 = arith.cmpf ogt, %659, %669 : vector<8x128xf32>
    %671 = arith.extui %670 : vector<8x128xi1> to vector<8x128xi32>
    %672 = arith.sitofp %671 : vector<8x128xi32> to vector<8x128xf32>
    %cst_270 = arith.constant 0.899999976 : f32
    %673 = vector.broadcast %cst_270 : f32 to vector<8x128xf32>
    %674 = arith.mulf %673, %659 : vector<8x128xf32>
    %675 = arith.addf %674, %668 : vector<8x128xf32>
    %cst_271 = arith.constant 1.000000e+00 : f32
    %676 = vector.broadcast %cst_271 : f32 to vector<8x128xf32>
    %677 = arith.mulf %672, %676 : vector<8x128xf32>
    %678 = arith.subf %675, %677 : vector<8x128xf32>
    %cst_272 = arith.constant 1.000000e+00 : f32
    %679 = vector.broadcast %cst_272 : f32 to vector<8x128xf32>
    %680 = arith.cmpf ogt, %678, %679 : vector<8x128xf32>
    %681 = arith.extui %680 : vector<8x128xi1> to vector<8x128xi32>
    %682 = arith.sitofp %681 : vector<8x128xi32> to vector<8x128xf32>
    %c28_i32 = arith.constant 28 : i32
    %683 = tpu.dynamic_rotate %682 by %c28_i32 dim 1 : vector<8x128xf32>, i32 -> vector<8x128xf32>
    %c0_273 = arith.constant 0 : index
    %c0_274 = arith.constant 0 : index
    %684 = vector.load %arg6[%c0_273, %c0_274] : memref<8x128xf32, #tpu.memory_space<vmem>>, vector<8x128xf32>
    %685 = arith.addf %684, %683 : vector<8x128xf32>
    %c0_275 = arith.constant 0 : index
    %c0_276 = arith.constant 0 : index
    %686 = vector.load %arg6[%c0_275, %c0_276] : memref<8x128xf32, #tpu.memory_space<vmem>>, vector<8x128xf32>
    tpu.vector_store %arg6[%c0_275, %c0_276], %685 {strides = array<i32>} : memref<8x128xf32, #tpu.memory_space<vmem>>, vector<8x128xf32>,
    %c120_277 = arith.constant 120 : index
    %c0_278 = arith.constant 0 : index
    %687 = vector.load %arg7[%c120_277, %c0_278] : memref<200x128xf32, #tpu.memory_space<vmem>>, vector<40x128xf32>
    %c0_279 = arith.constant 0 : index
    %c0_280 = arith.constant 0 : index
    %688 = vector.load %arg4[%c0_279, %c0_280] : memref<128x128xf32, #tpu.memory_space<vmem>>, vector<128x128xf32>
    %cst_281 = arith.constant dense<0.000000e+00> : vector<40x128xf32>
    %689 = tpu.matmul %687, %688, %cst_281 {dimension_numbers = #tpu.dot_dimension_numbers<[1], [0], [0], [1], [0, 0, 1, 1], [], []>} : vector<40x128xf32>, vector<128x128xf32>, vector<40x128xf32> -> vector<40x128xf32>
    %c0_282 = arith.constant 0 : index
    %c0_283 = arith.constant 0 : index
    %690 = vector.load %arg5[%c0_282, %c0_283] : memref<1x128xf32, #tpu.memory_space<vmem>>, vector<1x128xf32>
    %691 = vector.broadcast %690 : vector<1x128xf32> to vector<40x128xf32>
    %692 = arith.addf %689, %691 : vector<40x128xf32>
    %693 = vector.extract_strided_slice %692 {offsets = [0, 0], sizes = [8, 128], strides = [1, 1]} : vector<40x128xf32> to vector<8x128xf32>
    %cst_284 = arith.constant 1.000000e+00 : f32
    %694 = vector.broadcast %cst_284 : f32 to vector<8x128xf32>
    %695 = arith.cmpf ogt, %678, %694 : vector<8x128xf32>
    %696 = arith.extui %695 : vector<8x128xi1> to vector<8x128xi32>
    %697 = arith.sitofp %696 : vector<8x128xi32> to vector<8x128xf32>
    %cst_285 = arith.constant 0.899999976 : f32
    %698 = vector.broadcast %cst_285 : f32 to vector<8x128xf32>
    %699 = arith.mulf %698, %678 : vector<8x128xf32>
    %700 = arith.addf %699, %693 : vector<8x128xf32>
    %cst_286 = arith.constant 1.000000e+00 : f32
    %701 = vector.broadcast %cst_286 : f32 to vector<8x128xf32>
    %702 = arith.mulf %697, %701 : vector<8x128xf32>
    %703 = arith.subf %700, %702 : vector<8x128xf32>
    %cst_287 = arith.constant 1.000000e+00 : f32
    %704 = vector.broadcast %cst_287 : f32 to vector<8x128xf32>
    %705 = arith.cmpf ogt, %703, %704 : vector<8x128xf32>
    %706 = arith.extui %705 : vector<8x128xi1> to vector<8x128xi32>
    %707 = arith.sitofp %706 : vector<8x128xi32> to vector<8x128xf32>
    %c30_i32 = arith.constant 30 : i32
    %708 = tpu.dynamic_rotate %707 by %c30_i32 dim 1 : vector<8x128xf32>, i32 -> vector<8x128xf32>
    %c0_288 = arith.constant 0 : index
    %c0_289 = arith.constant 0 : index
    %709 = vector.load %arg6[%c0_288, %c0_289] : memref<8x128xf32, #tpu.memory_space<vmem>>, vector<8x128xf32>
    %710 = arith.addf %709, %708 : vector<8x128xf32>
    %c0_290 = arith.constant 0 : index
    %c0_291 = arith.constant 0 : index
    %711 = vector.load %arg6[%c0_290, %c0_291] : memref<8x128xf32, #tpu.memory_space<vmem>>, vector<8x128xf32>
    tpu.vector_store %arg6[%c0_290, %c0_291], %710 {strides = array<i32>} : memref<8x128xf32, #tpu.memory_space<vmem>>, vector<8x128xf32>,
    %712 = vector.extract_strided_slice %692 {offsets = [8, 0], sizes = [8, 128], strides = [1, 1]} : vector<40x128xf32> to vector<8x128xf32>
    %cst_292 = arith.constant 1.000000e+00 : f32
    %713 = vector.broadcast %cst_292 : f32 to vector<8x128xf32>
    %714 = arith.cmpf ogt, %703, %713 : vector<8x128xf32>
    %715 = arith.extui %714 : vector<8x128xi1> to vector<8x128xi32>
    %716 = arith.sitofp %715 : vector<8x128xi32> to vector<8x128xf32>
    %cst_293 = arith.constant 0.899999976 : f32
    %717 = vector.broadcast %cst_293 : f32 to vector<8x128xf32>
    %718 = arith.mulf %717, %703 : vector<8x128xf32>
    %719 = arith.addf %718, %712 : vector<8x128xf32>
    %cst_294 = arith.constant 1.000000e+00 : f32
    %720 = vector.broadcast %cst_294 : f32 to vector<8x128xf32>
    %721 = arith.mulf %716, %720 : vector<8x128xf32>
    %722 = arith.subf %719, %721 : vector<8x128xf32>
    %cst_295 = arith.constant 1.000000e+00 : f32
    %723 = vector.broadcast %cst_295 : f32 to vector<8x128xf32>
    %724 = arith.cmpf ogt, %722, %723 : vector<8x128xf32>
    %725 = arith.extui %724 : vector<8x128xi1> to vector<8x128xi32>
    %726 = arith.sitofp %725 : vector<8x128xi32> to vector<8x128xf32>
    %c32_i32 = arith.constant 32 : i32
    %727 = tpu.dynamic_rotate %726 by %c32_i32 dim 1 : vector<8x128xf32>, i32 -> vector<8x128xf32>
    %c0_296 = arith.constant 0 : index
    %c0_297 = arith.constant 0 : index
    %728 = vector.load %arg6[%c0_296, %c0_297] : memref<8x128xf32, #tpu.memory_space<vmem>>, vector<8x128xf32>
    %729 = arith.addf %728, %727 : vector<8x128xf32>
    %c0_298 = arith.constant 0 : index
    %c0_299 = arith.constant 0 : index
    %730 = vector.load %arg6[%c0_298, %c0_299] : memref<8x128xf32, #tpu.memory_space<vmem>>, vector<8x128xf32>
    tpu.vector_store %arg6[%c0_298, %c0_299], %729 {strides = array<i32>} : memref<8x128xf32, #tpu.memory_space<vmem>>, vector<8x128xf32>,
    %731 = vector.extract_strided_slice %692 {offsets = [16, 0], sizes = [8, 128], strides = [1, 1]} : vector<40x128xf32> to vector<8x128xf32>
    %cst_300 = arith.constant 1.000000e+00 : f32
    %732 = vector.broadcast %cst_300 : f32 to vector<8x128xf32>
    %733 = arith.cmpf ogt, %722, %732 : vector<8x128xf32>
    %734 = arith.extui %733 : vector<8x128xi1> to vector<8x128xi32>
    %735 = arith.sitofp %734 : vector<8x128xi32> to vector<8x128xf32>
    %cst_301 = arith.constant 0.899999976 : f32
    %736 = vector.broadcast %cst_301 : f32 to vector<8x128xf32>
    %737 = arith.mulf %736, %722 : vector<8x128xf32>
    %738 = arith.addf %737, %731 : vector<8x128xf32>
    %cst_302 = arith.constant 1.000000e+00 : f32
    %739 = vector.broadcast %cst_302 : f32 to vector<8x128xf32>
    %740 = arith.mulf %735, %739 : vector<8x128xf32>
    %741 = arith.subf %738, %740 : vector<8x128xf32>
    %cst_303 = arith.constant 1.000000e+00 : f32
    %742 = vector.broadcast %cst_303 : f32 to vector<8x128xf32>
    %743 = arith.cmpf ogt, %741, %742 : vector<8x128xf32>
    %744 = arith.extui %743 : vector<8x128xi1> to vector<8x128xi32>
    %745 = arith.sitofp %744 : vector<8x128xi32> to vector<8x128xf32>
    %c34_i32 = arith.constant 34 : i32
    %746 = tpu.dynamic_rotate %745 by %c34_i32 dim 1 : vector<8x128xf32>, i32 -> vector<8x128xf32>
    %c0_304 = arith.constant 0 : index
    %c0_305 = arith.constant 0 : index
    %747 = vector.load %arg6[%c0_304, %c0_305] : memref<8x128xf32, #tpu.memory_space<vmem>>, vector<8x128xf32>
    %748 = arith.addf %747, %746 : vector<8x128xf32>
    %c0_306 = arith.constant 0 : index
    %c0_307 = arith.constant 0 : index
    %749 = vector.load %arg6[%c0_306, %c0_307] : memref<8x128xf32, #tpu.memory_space<vmem>>, vector<8x128xf32>
    tpu.vector_store %arg6[%c0_306, %c0_307], %748 {strides = array<i32>} : memref<8x128xf32, #tpu.memory_space<vmem>>, vector<8x128xf32>,
    %750 = vector.extract_strided_slice %692 {offsets = [24, 0], sizes = [8, 128], strides = [1, 1]} : vector<40x128xf32> to vector<8x128xf32>
    %cst_308 = arith.constant 1.000000e+00 : f32
    %751 = vector.broadcast %cst_308 : f32 to vector<8x128xf32>
    %752 = arith.cmpf ogt, %741, %751 : vector<8x128xf32>
    %753 = arith.extui %752 : vector<8x128xi1> to vector<8x128xi32>
    %754 = arith.sitofp %753 : vector<8x128xi32> to vector<8x128xf32>
    %cst_309 = arith.constant 0.899999976 : f32
    %755 = vector.broadcast %cst_309 : f32 to vector<8x128xf32>
    %756 = arith.mulf %755, %741 : vector<8x128xf32>
    %757 = arith.addf %756, %750 : vector<8x128xf32>
    %cst_310 = arith.constant 1.000000e+00 : f32
    %758 = vector.broadcast %cst_310 : f32 to vector<8x128xf32>
    %759 = arith.mulf %754, %758 : vector<8x128xf32>
    %760 = arith.subf %757, %759 : vector<8x128xf32>
    %cst_311 = arith.constant 1.000000e+00 : f32
    %761 = vector.broadcast %cst_311 : f32 to vector<8x128xf32>
    %762 = arith.cmpf ogt, %760, %761 : vector<8x128xf32>
    %763 = arith.extui %762 : vector<8x128xi1> to vector<8x128xi32>
    %764 = arith.sitofp %763 : vector<8x128xi32> to vector<8x128xf32>
    %c36_i32 = arith.constant 36 : i32
    %765 = tpu.dynamic_rotate %764 by %c36_i32 dim 1 : vector<8x128xf32>, i32 -> vector<8x128xf32>
    %c0_312 = arith.constant 0 : index
    %c0_313 = arith.constant 0 : index
    %766 = vector.load %arg6[%c0_312, %c0_313] : memref<8x128xf32, #tpu.memory_space<vmem>>, vector<8x128xf32>
    %767 = arith.addf %766, %765 : vector<8x128xf32>
    %c0_314 = arith.constant 0 : index
    %c0_315 = arith.constant 0 : index
    %768 = vector.load %arg6[%c0_314, %c0_315] : memref<8x128xf32, #tpu.memory_space<vmem>>, vector<8x128xf32>
    tpu.vector_store %arg6[%c0_314, %c0_315], %767 {strides = array<i32>} : memref<8x128xf32, #tpu.memory_space<vmem>>, vector<8x128xf32>,
    %769 = vector.extract_strided_slice %692 {offsets = [32, 0], sizes = [8, 128], strides = [1, 1]} : vector<40x128xf32> to vector<8x128xf32>
    %cst_316 = arith.constant 1.000000e+00 : f32
    %770 = vector.broadcast %cst_316 : f32 to vector<8x128xf32>
    %771 = arith.cmpf ogt, %760, %770 : vector<8x128xf32>
    %772 = arith.extui %771 : vector<8x128xi1> to vector<8x128xi32>
    %773 = arith.sitofp %772 : vector<8x128xi32> to vector<8x128xf32>
    %cst_317 = arith.constant 0.899999976 : f32
    %774 = vector.broadcast %cst_317 : f32 to vector<8x128xf32>
    %775 = arith.mulf %774, %760 : vector<8x128xf32>
    %776 = arith.addf %775, %769 : vector<8x128xf32>
    %cst_318 = arith.constant 1.000000e+00 : f32
    %777 = vector.broadcast %cst_318 : f32 to vector<8x128xf32>
    %778 = arith.mulf %773, %777 : vector<8x128xf32>
    %779 = arith.subf %776, %778 : vector<8x128xf32>
    %cst_319 = arith.constant 1.000000e+00 : f32
    %780 = vector.broadcast %cst_319 : f32 to vector<8x128xf32>
    %781 = arith.cmpf ogt, %779, %780 : vector<8x128xf32>
    %782 = arith.extui %781 : vector<8x128xi1> to vector<8x128xi32>
    %783 = arith.sitofp %782 : vector<8x128xi32> to vector<8x128xf32>
    %c38_i32 = arith.constant 38 : i32
    %784 = tpu.dynamic_rotate %783 by %c38_i32 dim 1 : vector<8x128xf32>, i32 -> vector<8x128xf32>
    %c0_320 = arith.constant 0 : index
    %c0_321 = arith.constant 0 : index
    %785 = vector.load %arg6[%c0_320, %c0_321] : memref<8x128xf32, #tpu.memory_space<vmem>>, vector<8x128xf32>
    %786 = arith.addf %785, %784 : vector<8x128xf32>
    %c0_322 = arith.constant 0 : index
    %c0_323 = arith.constant 0 : index
    %787 = vector.load %arg6[%c0_322, %c0_323] : memref<8x128xf32, #tpu.memory_space<vmem>>, vector<8x128xf32>
    tpu.vector_store %arg6[%c0_322, %c0_323], %786 {strides = array<i32>} : memref<8x128xf32, #tpu.memory_space<vmem>>, vector<8x128xf32>,
    %c160_324 = arith.constant 160 : index
    %c0_325 = arith.constant 0 : index
    %788 = vector.load %arg7[%c160_324, %c0_325] : memref<200x128xf32, #tpu.memory_space<vmem>>, vector<40x128xf32>
    %c0_326 = arith.constant 0 : index
    %c0_327 = arith.constant 0 : index
    %789 = vector.load %arg4[%c0_326, %c0_327] : memref<128x128xf32, #tpu.memory_space<vmem>>, vector<128x128xf32>
    %cst_328 = arith.constant dense<0.000000e+00> : vector<40x128xf32>
    %790 = tpu.matmul %788, %789, %cst_328 {dimension_numbers = #tpu.dot_dimension_numbers<[1], [0], [0], [1], [0, 0, 1, 1], [], []>} : vector<40x128xf32>, vector<128x128xf32>, vector<40x128xf32> -> vector<40x128xf32>
    %c0_329 = arith.constant 0 : index
    %c0_330 = arith.constant 0 : index
    %791 = vector.load %arg5[%c0_329, %c0_330] : memref<1x128xf32, #tpu.memory_space<vmem>>, vector<1x128xf32>
    %792 = vector.broadcast %791 : vector<1x128xf32> to vector<40x128xf32>
    %793 = arith.addf %790, %792 : vector<40x128xf32>
    %794 = vector.extract_strided_slice %793 {offsets = [0, 0], sizes = [8, 128], strides = [1, 1]} : vector<40x128xf32> to vector<8x128xf32>
    %cst_331 = arith.constant 1.000000e+00 : f32
    %795 = vector.broadcast %cst_331 : f32 to vector<8x128xf32>
    %796 = arith.cmpf ogt, %779, %795 : vector<8x128xf32>
    %797 = arith.extui %796 : vector<8x128xi1> to vector<8x128xi32>
    %798 = arith.sitofp %797 : vector<8x128xi32> to vector<8x128xf32>
    %cst_332 = arith.constant 0.899999976 : f32
    %799 = vector.broadcast %cst_332 : f32 to vector<8x128xf32>
    %800 = arith.mulf %799, %779 : vector<8x128xf32>
    %801 = arith.addf %800, %794 : vector<8x128xf32>
    %cst_333 = arith.constant 1.000000e+00 : f32
    %802 = vector.broadcast %cst_333 : f32 to vector<8x128xf32>
    %803 = arith.mulf %798, %802 : vector<8x128xf32>
    %804 = arith.subf %801, %803 : vector<8x128xf32>
    %cst_334 = arith.constant 1.000000e+00 : f32
    %805 = vector.broadcast %cst_334 : f32 to vector<8x128xf32>
    %806 = arith.cmpf ogt, %804, %805 : vector<8x128xf32>
    %807 = arith.extui %806 : vector<8x128xi1> to vector<8x128xi32>
    %808 = arith.sitofp %807 : vector<8x128xi32> to vector<8x128xf32>
    %c40_i32 = arith.constant 40 : i32
    %809 = tpu.dynamic_rotate %808 by %c40_i32 dim 1 : vector<8x128xf32>, i32 -> vector<8x128xf32>
    %c0_335 = arith.constant 0 : index
    %c0_336 = arith.constant 0 : index
    %810 = vector.load %arg6[%c0_335, %c0_336] : memref<8x128xf32, #tpu.memory_space<vmem>>, vector<8x128xf32>
    %811 = arith.addf %810, %809 : vector<8x128xf32>
    %c0_337 = arith.constant 0 : index
    %c0_338 = arith.constant 0 : index
    %812 = vector.load %arg6[%c0_337, %c0_338] : memref<8x128xf32, #tpu.memory_space<vmem>>, vector<8x128xf32>
    tpu.vector_store %arg6[%c0_337, %c0_338], %811 {strides = array<i32>} : memref<8x128xf32, #tpu.memory_space<vmem>>, vector<8x128xf32>,
    %813 = vector.extract_strided_slice %793 {offsets = [8, 0], sizes = [8, 128], strides = [1, 1]} : vector<40x128xf32> to vector<8x128xf32>
    %cst_339 = arith.constant 1.000000e+00 : f32
    %814 = vector.broadcast %cst_339 : f32 to vector<8x128xf32>
    %815 = arith.cmpf ogt, %804, %814 : vector<8x128xf32>
    %816 = arith.extui %815 : vector<8x128xi1> to vector<8x128xi32>
    %817 = arith.sitofp %816 : vector<8x128xi32> to vector<8x128xf32>
    %cst_340 = arith.constant 0.899999976 : f32
    %818 = vector.broadcast %cst_340 : f32 to vector<8x128xf32>
    %819 = arith.mulf %818, %804 : vector<8x128xf32>
    %820 = arith.addf %819, %813 : vector<8x128xf32>
    %cst_341 = arith.constant 1.000000e+00 : f32
    %821 = vector.broadcast %cst_341 : f32 to vector<8x128xf32>
    %822 = arith.mulf %817, %821 : vector<8x128xf32>
    %823 = arith.subf %820, %822 : vector<8x128xf32>
    %cst_342 = arith.constant 1.000000e+00 : f32
    %824 = vector.broadcast %cst_342 : f32 to vector<8x128xf32>
    %825 = arith.cmpf ogt, %823, %824 : vector<8x128xf32>
    %826 = arith.extui %825 : vector<8x128xi1> to vector<8x128xi32>
    %827 = arith.sitofp %826 : vector<8x128xi32> to vector<8x128xf32>
    %c42_i32 = arith.constant 42 : i32
    %828 = tpu.dynamic_rotate %827 by %c42_i32 dim 1 : vector<8x128xf32>, i32 -> vector<8x128xf32>
    %c0_343 = arith.constant 0 : index
    %c0_344 = arith.constant 0 : index
    %829 = vector.load %arg6[%c0_343, %c0_344] : memref<8x128xf32, #tpu.memory_space<vmem>>, vector<8x128xf32>
    %830 = arith.addf %829, %828 : vector<8x128xf32>
    %c0_345 = arith.constant 0 : index
    %c0_346 = arith.constant 0 : index
    %831 = vector.load %arg6[%c0_345, %c0_346] : memref<8x128xf32, #tpu.memory_space<vmem>>, vector<8x128xf32>
    tpu.vector_store %arg6[%c0_345, %c0_346], %830 {strides = array<i32>} : memref<8x128xf32, #tpu.memory_space<vmem>>, vector<8x128xf32>,
    %832 = vector.extract_strided_slice %793 {offsets = [16, 0], sizes = [8, 128], strides = [1, 1]} : vector<40x128xf32> to vector<8x128xf32>
    %cst_347 = arith.constant 1.000000e+00 : f32
    %833 = vector.broadcast %cst_347 : f32 to vector<8x128xf32>
    %834 = arith.cmpf ogt, %823, %833 : vector<8x128xf32>
    %835 = arith.extui %834 : vector<8x128xi1> to vector<8x128xi32>
    %836 = arith.sitofp %835 : vector<8x128xi32> to vector<8x128xf32>
    %cst_348 = arith.constant 0.899999976 : f32
    %837 = vector.broadcast %cst_348 : f32 to vector<8x128xf32>
    %838 = arith.mulf %837, %823 : vector<8x128xf32>
    %839 = arith.addf %838, %832 : vector<8x128xf32>
    %cst_349 = arith.constant 1.000000e+00 : f32
    %840 = vector.broadcast %cst_349 : f32 to vector<8x128xf32>
    %841 = arith.mulf %836, %840 : vector<8x128xf32>
    %842 = arith.subf %839, %841 : vector<8x128xf32>
    %cst_350 = arith.constant 1.000000e+00 : f32
    %843 = vector.broadcast %cst_350 : f32 to vector<8x128xf32>
    %844 = arith.cmpf ogt, %842, %843 : vector<8x128xf32>
    %845 = arith.extui %844 : vector<8x128xi1> to vector<8x128xi32>
    %846 = arith.sitofp %845 : vector<8x128xi32> to vector<8x128xf32>
    %c44_i32 = arith.constant 44 : i32
    %847 = tpu.dynamic_rotate %846 by %c44_i32 dim 1 : vector<8x128xf32>, i32 -> vector<8x128xf32>
    %c0_351 = arith.constant 0 : index
    %c0_352 = arith.constant 0 : index
    %848 = vector.load %arg6[%c0_351, %c0_352] : memref<8x128xf32, #tpu.memory_space<vmem>>, vector<8x128xf32>
    %849 = arith.addf %848, %847 : vector<8x128xf32>
    %c0_353 = arith.constant 0 : index
    %c0_354 = arith.constant 0 : index
    %850 = vector.load %arg6[%c0_353, %c0_354] : memref<8x128xf32, #tpu.memory_space<vmem>>, vector<8x128xf32>
    tpu.vector_store %arg6[%c0_353, %c0_354], %849 {strides = array<i32>} : memref<8x128xf32, #tpu.memory_space<vmem>>, vector<8x128xf32>,
    %851 = vector.extract_strided_slice %793 {offsets = [24, 0], sizes = [8, 128], strides = [1, 1]} : vector<40x128xf32> to vector<8x128xf32>
    %cst_355 = arith.constant 1.000000e+00 : f32
    %852 = vector.broadcast %cst_355 : f32 to vector<8x128xf32>
    %853 = arith.cmpf ogt, %842, %852 : vector<8x128xf32>
    %854 = arith.extui %853 : vector<8x128xi1> to vector<8x128xi32>
    %855 = arith.sitofp %854 : vector<8x128xi32> to vector<8x128xf32>
    %cst_356 = arith.constant 0.899999976 : f32
    %856 = vector.broadcast %cst_356 : f32 to vector<8x128xf32>
    %857 = arith.mulf %856, %842 : vector<8x128xf32>
    %858 = arith.addf %857, %851 : vector<8x128xf32>
    %cst_357 = arith.constant 1.000000e+00 : f32
    %859 = vector.broadcast %cst_357 : f32 to vector<8x128xf32>
    %860 = arith.mulf %855, %859 : vector<8x128xf32>
    %861 = arith.subf %858, %860 : vector<8x128xf32>
    %cst_358 = arith.constant 1.000000e+00 : f32
    %862 = vector.broadcast %cst_358 : f32 to vector<8x128xf32>
    %863 = arith.cmpf ogt, %861, %862 : vector<8x128xf32>
    %864 = arith.extui %863 : vector<8x128xi1> to vector<8x128xi32>
    %865 = arith.sitofp %864 : vector<8x128xi32> to vector<8x128xf32>
    %c46_i32 = arith.constant 46 : i32
    %866 = tpu.dynamic_rotate %865 by %c46_i32 dim 1 : vector<8x128xf32>, i32 -> vector<8x128xf32>
    %c0_359 = arith.constant 0 : index
    %c0_360 = arith.constant 0 : index
    %867 = vector.load %arg6[%c0_359, %c0_360] : memref<8x128xf32, #tpu.memory_space<vmem>>, vector<8x128xf32>
    %868 = arith.addf %867, %866 : vector<8x128xf32>
    %c0_361 = arith.constant 0 : index
    %c0_362 = arith.constant 0 : index
    %869 = vector.load %arg6[%c0_361, %c0_362] : memref<8x128xf32, #tpu.memory_space<vmem>>, vector<8x128xf32>
    tpu.vector_store %arg6[%c0_361, %c0_362], %868 {strides = array<i32>} : memref<8x128xf32, #tpu.memory_space<vmem>>, vector<8x128xf32>,
    %870 = vector.extract_strided_slice %793 {offsets = [32, 0], sizes = [8, 128], strides = [1, 1]} : vector<40x128xf32> to vector<8x128xf32>
    %cst_363 = arith.constant 1.000000e+00 : f32
    %871 = vector.broadcast %cst_363 : f32 to vector<8x128xf32>
    %872 = arith.cmpf ogt, %861, %871 : vector<8x128xf32>
    %873 = arith.extui %872 : vector<8x128xi1> to vector<8x128xi32>
    %874 = arith.sitofp %873 : vector<8x128xi32> to vector<8x128xf32>
    %cst_364 = arith.constant 0.899999976 : f32
    %875 = vector.broadcast %cst_364 : f32 to vector<8x128xf32>
    %876 = arith.mulf %875, %861 : vector<8x128xf32>
    %877 = arith.addf %876, %870 : vector<8x128xf32>
    %cst_365 = arith.constant 1.000000e+00 : f32
    %878 = vector.broadcast %cst_365 : f32 to vector<8x128xf32>
    %879 = arith.mulf %874, %878 : vector<8x128xf32>
    %880 = arith.subf %877, %879 : vector<8x128xf32>
    %cst_366 = arith.constant 1.000000e+00 : f32
    %881 = vector.broadcast %cst_366 : f32 to vector<8x128xf32>
    %882 = arith.cmpf ogt, %880, %881 : vector<8x128xf32>
    %883 = arith.extui %882 : vector<8x128xi1> to vector<8x128xi32>
    %884 = arith.sitofp %883 : vector<8x128xi32> to vector<8x128xf32>
    %c48_i32 = arith.constant 48 : i32
    %885 = tpu.dynamic_rotate %884 by %c48_i32 dim 1 : vector<8x128xf32>, i32 -> vector<8x128xf32>
    %c0_367 = arith.constant 0 : index
    %c0_368 = arith.constant 0 : index
    %886 = vector.load %arg6[%c0_367, %c0_368] : memref<8x128xf32, #tpu.memory_space<vmem>>, vector<8x128xf32>
    %887 = arith.addf %886, %885 : vector<8x128xf32>
    %c0_369 = arith.constant 0 : index
    %c0_370 = arith.constant 0 : index
    %888 = vector.load %arg6[%c0_369, %c0_370] : memref<8x128xf32, #tpu.memory_space<vmem>>, vector<8x128xf32>
    tpu.vector_store %arg6[%c0_369, %c0_370], %887 {strides = array<i32>} : memref<8x128xf32, #tpu.memory_space<vmem>>, vector<8x128xf32>,
    return
  }
  func.func @transform_0(%arg0: i32) -> (i32, i32) {
    %c0_i32 = arith.constant 0 : i32
    %c0_i32_0 = arith.constant 0 : i32
    return %arg0, %c0_i32 : i32, i32
  }
  func.func @transform_1(%arg0: i32) -> (i32, i32) {
    %c0_i32 = arith.constant 0 : i32
    %c0_i32_0 = arith.constant 0 : i32
    %c0_i32_1 = arith.constant 0 : i32
    return %c0_i32, %c0_i32_0 : i32, i32
  }
  func.func @transform_2(%arg0: i32) -> (i32, i32) {
    %c0_i32 = arith.constant 0 : i32
    %c0_i32_0 = arith.constant 0 : i32
    %c0_i32_1 = arith.constant 0 : i32
    return %c0_i32, %c0_i32_0 : i32, i32
  }
  func.func @transform_3(%arg0: i32) -> (i32, i32) {
    %c0_i32 = arith.constant 0 : i32
    %c0_i32_0 = arith.constant 0 : i32
    %c0_i32_1 = arith.constant 0 : i32
    return %c0_i32, %c0_i32_0 : i32, i32
  }
  func.func @transform_4(%arg0: i32) -> (i32, i32) {
    %c0_i32 = arith.constant 0 : i32
    %c0_i32_0 = arith.constant 0 : i32
    %c0_i32_1 = arith.constant 0 : i32
    return %c0_i32, %c0_i32_0 : i32, i32
  }
  func.func @transform_5(%arg0: i32) -> (i32, i32) {
    %c0_i32 = arith.constant 0 : i32
    %c0_i32_0 = arith.constant 0 : i32
    return %arg0, %c0_i32 : i32, i32
  }
}

</mosaic_0001>

<bundles_post_ra>
// kernel: snn_forward.1
= control target key start
LH: loop header
LB: loop body
LE: loop exit
PB: predicated region body
PF: predicated region fallthrough
CT: control target
= control target key end

     0   :  { %s1131_s13 = smov 2   ;;  %s1132_s14 = smov 4   ;;  %s1773_s1 = inlined_call_operand.vmem [shape: f32[896,128], index: 1, kind: input, shape index: {}]   ;;  %s1774_s0 = inlined_call_operand.vmem [shape: f32[8,896], index: 0, kind: input, shape index: {}]   ;;  %s1775_s2 = inlined_call_operand.vmem [shape: f32[1,128], index: 2, kind: input, shape index: {}]   ;;  %s1776_s3 = inlined_call_operand.vmem [shape: f32[128,128], index: 3, kind: input, shape index: {}]   ;;  %s1777_s4 = inlined_call_operand.vmem [shape: f32[1,128], index: 4, kind: input, shape index: {}]   ;;  %s1778_s5 = inlined_call_operand.vmem [shape: f32[8,128], index: 5, kind: output, shape index: {}]  }
   0x1   :  { %v74_v0 = vld [vmem:[%s1773_s1 + $0x178] sm:$0xff]  ;;  %v73_v2 = vld [vmem:[%s1773_s1 + $0x170] sm:$0xff]  ;;  %v72_v5 = vld [vmem:[%s1773_s1 + $0x168] sm:$0xff]  ;;  %s1133_s15 = smov 6   ;;  %s1134_s18 = smov 8  }
   0x2   :  { %v42_v1 = vld [vmem:[%s1773_s1 + $0x78] sm:$0xff]  ;;  %183 = vmatpush.msra.mxu2 %v74_v0  ;;  %v41_v3 = vld [vmem:[%s1773_s1 + $0x70] sm:$0xff]  ;;  %v40_v6 = vld [vmem:[%s1773_s1 + $0x68] sm:$0xff]  ;;  %s1135_s19 = smov 10   ;;  %s1136_s20 = smov 12  }
   0x3   :  { %143 = vmatpush.msra.mxu0 %v42_v1  ;;  %v58_v4 = vld [vmem:[%s1773_s1 + $0xf8] sm:$0xff]  ;;  %v57_v7 = vld [vmem:[%s1773_s1 + $0xf0] sm:$0xff]  ;;  %v56_v8 = vld [vmem:[%s1773_s1 + $0xe8] sm:$0xff]  ;;  %s1137_s21 = smov 14   ;;  %s1138_s22 = smov 16  }
   0x4   :  { %163 = vmatpush.msra.mxu1 %v58_v4  ;;  %184 = vmatpush.msra.mxu2 %v73_v2  ;;  %v71_v9 = vld [vmem:[%s1773_s1 + $0x160] sm:$0xff]  ;;  %v70_v12 = vld [vmem:[%s1773_s1 + $0x158] sm:$0xff]  ;;  %v69_v15 = vld [vmem:[%s1773_s1 + $0x150] sm:$0xff]  ;;  %s1139_s23 = smov 18   ;;  %s1140_s24 = smov 20  }
   0x5   :  { %144 = vmatpush.msra.mxu0 %v41_v3  ;;  %v39_v10 = vld [vmem:[%s1773_s1 + $0x60] sm:$0xff]  ;;  %v38_v13 = vld [vmem:[%s1773_s1 + $0x58] sm:$0xff]  ;;  %v37_v16 = vld [vmem:[%s1773_s1 + $0x50] sm:$0xff]  ;;  %s1141_s25 = smov 22   ;;  %s1142_s26 = smov 24  }
   0x6   :  { %164 = vmatpush.msra.mxu1 %v57_v7  ;;  %185 = vmatpush.msra.mxu2 %v72_v5  ;;  %v55_v11 = vld [vmem:[%s1773_s1 + $0xe0] sm:$0xff]  ;;  %v54_v14 = vld [vmem:[%s1773_s1 + $0xd8] sm:$0xff]  ;;  %v53_v17 = vld [vmem:[%s1773_s1 + $0xd0] sm:$0xff]  ;;  %s1143_s29 = smov 26   ;;  %s1144_s30 = smov 28  }
   0x7   :  { %145 = vmatpush.msra.mxu0 %v40_v6  ;;  %v68_v18 = vld [vmem:[%s1773_s1 + $0x148] sm:$0xff]  ;;  %v67_v21 = vld [vmem:[%s1773_s1 + $0x140] sm:$0xff]  ;;  %v90_v23 = vld [vmem:[%s1773_s1 + $0x1f8] sm:$0xff]  ;;  %s1145_s6 = smov 30   ;;  %s1146_s7 = smov 32  }
   0x8   :  { %165 = vmatpush.msra.mxu1 %v56_v8  ;;  %186 = vmatpush.msra.mxu2 %v71_v9  ;;  %v36_v19 = vld [vmem:[%s1773_s1 + $0x48] sm:$0xff]  ;;  %v35_v22 = vld [vmem:[%s1773_s1 + $0x40] sm:$0xff]  ;;  %v89_v25 = vld [vmem:[%s1773_s1 + $0x1f0] sm:$0xff]  ;;  %s1147_s8 = smov 34   ;;  %s1148_s11 = smov 36  }
   0x9   :  { %146 = vmatpush.msra.mxu0 %v39_v10  ;;  %v52_v20 = vld [vmem:[%s1773_s1 + $0xc8] sm:$0xff]  ;;  %v51_v24 = vld [vmem:[%s1773_s1 + $0xc0] sm:$0xff]  ;;  %v66_v26 = vld [vmem:[%s1773_s1 + $0x138] sm:$0xff]  ;;  %203 = vmatpush.msra.mxu3 %v90_v23  ;;  %s1149_s12 = smov 38  }
   0xa   :  { %166 = vmatpush.msra.mxu1 %v55_v11  ;;  %187 = vmatpush.msra.mxu2 %v70_v12  ;;  %v34_v27 = vld [vmem:[%s1773_s1 + $0x38] sm:$0xff]  ;;  %v88_v29 = vld [vmem:[%s1773_s1 + $0x1e8] sm:$0xff]  ;;  %v65_v30 = vld [vmem:[%s1773_s1 + $0x130] sm:$0xff] }
   0xb   :  { %147 = vmatpush.msra.mxu0 %v38_v13  ;;  %v50_v28 = vld [vmem:[%s1773_s1 + $0xb8] sm:$0xff]  ;;  %v33_v31 = vld [vmem:[%s1773_s1 + $0x30] sm:$0xff]  ;;  %204 = vmatpush.msra.mxu3 %v89_v25  ;;  %v87_v33 = vld [vmem:[%s1773_s1 + $0x1e0] sm:$0xff] }
   0xc   :  { %167 = vmatpush.msra.mxu1 %v54_v14  ;;  %188 = vmatpush.msra.mxu2 %v69_v15  ;;  %v49_v32 = vld [vmem:[%s1773_s1 + $0xb0] sm:$0xff]  ;;  %v64_v34 = vld [vmem:[%s1773_s1 + $0x128] sm:$0xff]  ;;  %v86_v37 = vld [vmem:[%s1773_s1 + $0x1d8] sm:$0xff] }
   0xd   :  { %148 = vmatpush.msra.mxu0 %v37_v16  ;;  %v32_v35 = vld [vmem:[%s1773_s1 + $0x28] sm:$0xff]  ;;  %205 = vmatpush.msra.mxu3 %v88_v29  ;;  %v63_v38 = vld [vmem:[%s1773_s1 + $0x120] sm:$0xff]  ;;  %v85_v41 = vld [vmem:[%s1773_s1 + $0x1d0] sm:$0xff] }
   0xe   :  { %168 = vmatpush.msra.mxu1 %v53_v17  ;;  %189 = vmatpush.msra.mxu2 %v68_v18  ;;  %v48_v36 = vld [vmem:[%s1773_s1 + $0xa8] sm:$0xff]  ;;  %v31_v39 = vld [vmem:[%s1773_s1 + $0x20] sm:$0xff]  ;;  %v62_v42 = vld [vmem:[%s1773_s1 + $0x118] sm:$0xff] }
   0xf   :  { %149 = vmatpush.msra.mxu0 %v36_v19  ;;  %206 = vmatpush.msra.mxu3 %v87_v33  ;;  %v47_v40 = vld [vmem:[%s1773_s1 + $0xa0] sm:$0xff]  ;;  %v30_v43 = vld [vmem:[%s1773_s1 + $0x18] sm:$0xff]  ;;  %v84_v45 = vld [vmem:[%s1773_s1 + $0x1c8] sm:$0xff] }
  0x10   :  { %169 = vmatpush.msra.mxu1 %v52_v20  ;;  %190 = vmatpush.msra.mxu2 %v67_v21  ;;  %v46_v44 = vld [vmem:[%s1773_s1 + $0x98] sm:$0xff]  ;;  %v61_v46 = vld [vmem:[%s1773_s1 + $0x110] sm:$0xff]  ;;  %v83_v49 = vld [vmem:[%s1773_s1 + $0x1c0] sm:$0xff] }
  0x11   :  { %150 = vmatpush.msra.mxu0 %v35_v22  ;;  %207 = vmatpush.msra.mxu3 %v86_v37  ;;  %v29_v47 = vld [vmem:[%s1773_s1 + $0x10] sm:$0xff]  ;;  %v60_v50 = vld [vmem:[%s1773_s1 + $0x108] sm:$0xff]  ;;  %v82_v53 = vld [vmem:[%s1773_s1 + $0x1b8] sm:$0xff] }
  0x12   :  { %170 = vmatpush.msra.mxu1 %v51_v24  ;;  %191 = vmatpush.msra.mxu2 %v66_v26  ;;  %v45_v48 = vld [vmem:[%s1773_s1 + $0x90] sm:$0xff]  ;;  %v28_v51 = vld [vmem:[%s1773_s1 + $0x8] sm:$0xff]  ;;  %v59_v54 = vld [vmem:[%s1773_s1 + $0x100] sm:$0xff] }
  0x13   :  { %151 = vmatpush.msra.mxu0 %v34_v27  ;;  %208 = vmatpush.msra.mxu3 %v85_v41  ;;  %v44_v52 = vld [vmem:[%s1773_s1 + $0x88] sm:$0xff]  ;;  %v27_v55 = vld [vmem:[%s1773_s1] sm:$0xff]  ;;  %v138_v56 = vld [vmem:[%s1773_s1 + $0x378] sm:$0xff] }
  0x14   :  { %171 = vmatpush.msra.mxu1 %v50_v28  ;;  %192 = vmatpush.msra.mxu2 %v65_v30  ;;  %v106_v57 = vld [vmem:[%s1773_s1 + $0x278] sm:$0xff]  ;;  %v43_v58 = vld [vmem:[%s1773_s1 + $0x80] sm:$0xff]  ;;  %v81_v59 = vld [vmem:[%s1773_s1 + $0x1b0] sm:$0xff] }
  0x15   :  { %152 = vmatpush.msra.mxu0 %v33_v31  ;;  %209 = vmatpush.msra.mxu3 %v84_v45  ;;  %v137_v60 = vld [vmem:[%s1773_s1 + $0x370] sm:$0xff]  ;;  %v122_v62 = vld [vmem:[%s1773_s1 + $0x2f8] sm:$0xff]  ;;  %v80_v63 = vld [vmem:[%s1773_s1 + $0x1a8] sm:$0xff] }
  0x16   :  { %172 = vmatpush.msra.mxu1 %v49_v32  ;;  %193 = vmatpush.msra.mxu2 %v64_v34  ;;  %v105_v61 = vld [vmem:[%s1773_s1 + $0x270] sm:$0xff]  ;;  %v136_v0 = vld [vmem:[%s1773_s1 + $0x368] sm:$0xff]  ;;  %v79_v3 = vld [vmem:[%s1773_s1 + $0x1a0] sm:$0xff] }
  0x17   :  { %153 = vmatpush.msra.mxu0 %v32_v35  ;;  %210 = vmatpush.msra.mxu3 %v83_v49  ;;  %v104_v1 = vld [vmem:[%s1773_s1 + $0x268] sm:$0xff]  ;;  %v121_v2 = vld [vmem:[%s1773_s1 + $0x2f0] sm:$0xff]  ;;  %v135_v4 = vld [vmem:[%s1773_s1 + $0x360] sm:$0xff] }
  0x18   :  { %173 = vmatpush.msra.mxu1 %v48_v36  ;;  %194 = vmatpush.msra.mxu2 %v63_v38  ;;  %v103_v5 = vld [vmem:[%s1773_s1 + $0x260] sm:$0xff]  ;;  %v120_v6 = vld [vmem:[%s1773_s1 + $0x2e8] sm:$0xff]  ;;  %v78_v7 = vld [vmem:[%s1773_s1 + $0x198] sm:$0xff] }
  0x19   :  { %154 = vmatpush.msra.mxu0 %v31_v39  ;;  %211 = vmatpush.msra.mxu3 %v82_v53  ;;  %v134_v8 = vld [vmem:[%s1773_s1 + $0x358] sm:$0xff]  ;;  %v119_v10 = vld [vmem:[%s1773_s1 + $0x2e0] sm:$0xff]  ;;  %v77_v11 = vld [vmem:[%s1773_s1 + $0x190] sm:$0xff] }
  0x1a   :  { %174 = vmatpush.msra.mxu1 %v47_v40  ;;  %195 = vmatpush.msra.mxu2 %v62_v42  ;;  %v102_v9 = vld [vmem:[%s1773_s1 + $0x258] sm:$0xff]  ;;  %v133_v12 = vld [vmem:[%s1773_s1 + $0x350] sm:$0xff]  ;;  %v76_v15 = vld [vmem:[%s1773_s1 + $0x188] sm:$0xff] }
  0x1b   :  { %155 = vmatpush.msra.mxu0 %v30_v43  ;;  %212 = vmatpush.msra.mxu3 %v81_v59  ;;  %v101_v13 = vld [vmem:[%s1773_s1 + $0x250] sm:$0xff]  ;;  %v118_v14 = vld [vmem:[%s1773_s1 + $0x2d8] sm:$0xff]  ;;  %v132_v16 = vld [vmem:[%s1773_s1 + $0x348] sm:$0xff] }
  0x1c   :  { %175 = vmatpush.msra.mxu1 %v46_v44  ;;  %196 = vmatpush.msra.mxu2 %v61_v46  ;;  %v100_v17 = vld [vmem:[%s1773_s1 + $0x248] sm:$0xff]  ;;  %v117_v18 = vld [vmem:[%s1773_s1 + $0x2d0] sm:$0xff]  ;;  %v131_v20 = vld [vmem:[%s1773_s1 + $0x340] sm:$0xff] }
  0x1d   :  { %156 = vmatpush.msra.mxu0 %v29_v47  ;;  %213 = vmatpush.msra.mxu3 %v80_v63  ;;  %v22_v19 = vld [vmem:[%s1774_s0 + $0x10] sm:$0xff]  ;;  %v99_v21 = vld [vmem:[%s1773_s1 + $0x240] sm:$0xff]  ;;  %v116_v22 = vld [vmem:[%s1773_s1 + $0x2c8] sm:$0xff] }
  0x1e   :  { %176 = vmatpush.msra.mxu1 %v45_v48  ;;  %197 = vmatpush.msra.mxu2 %v60_v50  ;;  %v75_v23 = vld [vmem:[%s1773_s1 + $0x180] sm:$0xff]  ;;  %v130_v24 = vld [vmem:[%s1773_s1 + $0x338] sm:$0xff]  ;;  %v129_v28 = vld [vmem:[%s1773_s1 + $0x330] sm:$0xff] }
  0x1f   :  { %157 = vmatpush.msra.mxu0 %v28_v51  ;;  %214 = vmatpush.msra.mxu3 %v79_v3  ;;  %v98_v25 = vld [vmem:[%s1773_s1 + $0x238] sm:$0xff]  ;;  %v115_v26 = vld [vmem:[%s1773_s1 + $0x2c0] sm:$0xff]  ;;  %v97_v29 = vld [vmem:[%s1773_s1 + $0x230] sm:$0xff] }
  0x20   :  { %177 = vmatpush.msra.mxu1 %v44_v52  ;;  %198 = vmatpush.msra.mxu2 %v59_v54  ;;  %v20_v27 = vld [vmem:[%s1774_s0] sm:$0xff]  ;;  %v114_v30 = vld [vmem:[%s1773_s1 + $0x2b8] sm:$0xff]  ;;  %v128_v32 = vld [vmem:[%s1773_s1 + $0x328] sm:$0xff] }
  0x21   :  { %158 = vmatpush.msra.mxu0 %v27_v55  ;;  %215 = vmatpush.msra.mxu3 %v78_v7  ;;  %v23_v31 = vld [vmem:[%s1774_s0 + $0x18] sm:$0xff]  ;;  %v96_v33 = vld [vmem:[%s1773_s1 + $0x228] sm:$0xff]  ;;  %v113_v34 = vld [vmem:[%s1773_s1 + $0x2b0] sm:$0xff] }
  0x22   :  { %263 = vmatpush.msrb.mxu2 %v138_v56  ;;  %178 = vmatpush.msra.mxu1 %v43_v58  ;;  %v1485_v35 = vld [vmem:[%s1776_s3 + $0x78] sm:$0xff]  ;;  %v127_v36 = vld [vmem:[%s1773_s1 + $0x320] sm:$0xff]  ;;  %v112_v38 = vld [vmem:[%s1773_s1 + $0x2a8] sm:$0xff] }
  0x23   :  { %223 = vmatpush.msrb.mxu0 %v106_v57  ;;  %216 = vmatpush.msra.mxu3 %v77_v11  ;;  %v95_v37 = vld [vmem:[%s1773_s1 + $0x220] sm:$0xff]  ;;  %v1499_v39 = vld [vmem:[%s1776_s3 + $0x70] sm:$0xff]  ;;  %v126_v40 = vld [vmem:[%s1773_s1 + $0x318] sm:$0xff] }
  0x24   :  { %264 = vmatpush.msrb.mxu2 %v137_v60  ;;  %243 = vmatpush.msrb.mxu1 %v122_v62  ;;  %v94_v41 = vld [vmem:[%s1773_s1 + $0x218] sm:$0xff]  ;;  %v111_v42 = vld [vmem:[%s1773_s1 + $0x2a0] sm:$0xff]  ;;  %v1514_v43 = vld [vmem:[%s1776_s3 + $0x68] sm:$0xff] }
  0x25   :  { %224 = vmatpush.msrb.mxu0 %v105_v61  ;;  %217 = vmatpush.msra.mxu3 %v76_v15  ;;  %v125_v44 = vld [vmem:[%s1773_s1 + $0x310] sm:$0xff]  ;;  %v21_v45 = vld [vmem:[%s1774_s0 + $0x8] sm:$0xff]  ;;  %v110_v47 = vld [vmem:[%s1773_s1 + $0x298] sm:$0xff] }
  0x26   :  { %265 = vmatpush.msrb.mxu2 %v136_v0  ;;  %244 = vmatpush.msrb.mxu1 %v121_v2  ;;  %v93_v46 = vld [vmem:[%s1773_s1 + $0x210] sm:$0xff]  ;;  %v124_v48 = vld [vmem:[%s1773_s1 + $0x308] sm:$0xff]  ;;  %v1536_v49 = vld [vmem:[%s1776_s3 + $0x60] sm:$0xff] }
  0x27   :  { %225 = vmatpush.msrb.mxu0 %v104_v1  ;;  %199 = vmatmul.f32.vlgmr.msra.gmra.mxu2 %v22_v19  ;;  %v92_v50 = vld [vmem:[%s1773_s1 + $0x208] sm:$0xff]  ;;  %v109_v51 = vld [vmem:[%s1773_s1 + $0x290] sm:$0xff]  ;;  %v123_v52 = vld [vmem:[%s1773_s1 + $0x300] sm:$0xff] }
  0x28   :  { %266 = vmatpush.msrb.mxu2 %v135_v4  ;;  %245 = vmatpush.msrb.mxu1 %v120_v6  ;;  %v1550_v53 = vld [vmem:[%s1776_s3 + $0x58] sm:$0xff]  ;;  %v26_v54 = vld [vmem:[%s1774_s0 + $0x30] sm:$0xff]  ;;  %v91_v55 = vld [vmem:[%s1773_s1 + $0x200] sm:$0xff] }
  0x29   :  { %226 = vmatpush.msrb.mxu0 %v103_v5  ;;  %218 = vmatpush.msra.mxu3 %v75_v23  ;;  %v108_v56 = vld [vmem:[%s1773_s1 + $0x288] sm:$0xff]  ;;  %v24_v57 = vld [vmem:[%s1774_s0 + $0x20] sm:$0xff]  ;;  %v1569_v58 = vld [vmem:[%s1776_s3 + $0x50] sm:$0xff]  ;;  %v1129_v23 = vmov 1.0  }
  0x2a   :  { %267 = vmatpush.msrb.mxu2 %v134_v8  ;;  %246 = vmatpush.msrb.mxu1 %v119_v10  ;;  %v107_v59 = vld [vmem:[%s1773_s1 + $0x280] sm:$0xff]  ;;  %v25_v60 = vld [vmem:[%s1774_s0 + $0x28] sm:$0xff]  ;;  %v473_v63 = vld [vmem:[%s1776_s3 + $0x38] sm:$0xff] }
  0x2b   :  { %227 = vmatpush.msrb.mxu0 %v102_v9  ;;  %219 = vmatmul.f32.vlgmr.msra.gmra.mxu3 %v23_v31  ;;  %v1580_v61 = vld [vmem:[%s1776_s3 + $0x48] sm:$0xff]  ;;  %v1587_v62 = vld [vmem:[%s1776_s3 + $0x40] sm:$0xff]  ;;  %v472_v0 = vld [vmem:[%s1776_s3 + $0x30] sm:$0xff] }
  0x2c   :  { %268 = vmatpush.msrb.mxu2 %v133_v12  ;;  %247 = vmatpush.msrb.mxu1 %v118_v14  ;;  %v471_v1 = vld [vmem:[%s1776_s3 + $0x28] sm:$0xff]  ;;  %v470_v2 = vld [vmem:[%s1776_s3 + $0x20] sm:$0xff]  ;;  %v469_v3 = vld [vmem:[%s1776_s3 + $0x18] sm:$0xff] }
  0x2d   :  { %228 = vmatpush.msrb.mxu0 %v101_v13  ;;  %486 = vmatpush.msrb.mxu3 %v1485_v35  ;;  %v468_v4 = vld [vmem:[%s1776_s3 + $0x10] sm:$0xff]  ;;  %v467_v5 = vld [vmem:[%s1776_s3 + $0x8] sm:$0xff]  ;;  %v466_v6 = vld [vmem:[%s1776_s3] sm:$0xff]  ;;  %s1152_s3 = smov 44  }
  0x2e   :  { %269 = vmatpush.msrb.mxu2 %v132_v16  ;;  %248 = vmatpush.msrb.mxu1 %v117_v18  ;;  %v1123_v7 = vld [vmem:[%s1775_s2] ss:$0 sm:$0xff]  ;;  %s1151_s2 = smov 42  }
  0x2f   :  { %229 = vmatpush.msrb.mxu0 %v100_v17  ;;  %487 = vmatpush.msrb.mxu3 %v1499_v39 }
  0x30   :  { %270 = vmatpush.msrb.mxu2 %v131_v20  ;;  %249 = vmatpush.msrb.mxu1 %v116_v22 }
  0x31   :  { %230 = vmatpush.msrb.mxu0 %v99_v21  ;;  %488 = vmatpush.msrb.mxu3 %v1514_v43 }
  0x32   :  { %271 = vmatpush.msrb.mxu2 %v130_v24  ;;  %250 = vmatpush.msrb.mxu1 %v115_v26 }
  0x33   :  { %231 = vmatpush.msrb.mxu0 %v98_v25  ;;  %179 = vmatmul.f32.vlgmr.msra.gmra.mxu1 %v21_v45  ;;  %v1130_v25 = vmov 0.0  }
  0x34   :  { %159 = vmatmul.f32.vlgmr.msra.gmra.mxu0 %v20_v27  ;;  %272 = vmatpush.msrb.mxu2 %v129_v28 }
  0x35   :  { %232 = vmatpush.msrb.mxu0 %v97_v29  ;;  %251 = vmatpush.msrb.mxu1 %v114_v30 }
  0x36   :  { %273 = vmatpush.msrb.mxu2 %v128_v32  ;;  %489 = vmatpush.msrb.mxu3 %v1536_v49 }
  0x37   :  { %233 = vmatpush.msrb.mxu0 %v96_v33  ;;  %252 = vmatpush.msrb.mxu1 %v113_v34 }
  0x38   :  { %274 = vmatpush.msrb.mxu2 %v127_v36  ;;  %490 = vmatpush.msrb.mxu3 %v1550_v53 }
  0x39   :  { %234 = vmatpush.msrb.mxu0 %v95_v37  ;;  %253 = vmatpush.msrb.mxu1 %v112_v38 }
  0x3a   :  { %275 = vmatpush.msrb.mxu2 %v126_v40  ;;  %491 = vmatpush.msrb.mxu3 %v1569_v58 }
  0x3b   :  { %235 = vmatpush.msrb.mxu0 %v94_v41  ;;  %254 = vmatpush.msrb.mxu1 %v111_v42 }
  0x3c   :  { %276 = vmatpush.msrb.mxu2 %v125_v44  ;;  %492 = vmatpush.msrb.mxu3 %v1580_v61 }
  0x3d   :  { %236 = vmatpush.msrb.mxu0 %v93_v46  ;;  %255 = vmatpush.msrb.mxu1 %v110_v47 }
  0x3e   :  { %277 = vmatpush.msrb.mxu2 %v124_v48  ;;  %493 = vmatpush.msrb.mxu3 %v1587_v62 }
  0x3f   :  { %237 = vmatpush.msrb.mxu0 %v92_v50  ;;  %256 = vmatpush.msrb.mxu1 %v109_v51 }
  0x40   :  { %278 = vmatpush.msrb.mxu2 %v123_v52  ;;  %494 = vmatpush.msrb.mxu3 %v473_v63 }
  0x41   :  { %279 = vmatmul.f32.vlgmr.msrb.gmra.mxu2 %v26_v54  ;;  %238 = vmatpush.msrb.mxu0 %v91_v55 }
  0x42   :  { %257 = vmatpush.msrb.mxu1 %v108_v56  ;;  %239 = vmatmul.f32.vlgmr.msrb.gmra.mxu0 %v24_v57 }
  0x43   :  { %595 = vmatpush.msra.mxu0 %v1485_v35  ;;  %819 = vmatpush.msra.mxu2 %v1485_v35 }
  0x44   :  { %258 = vmatpush.msrb.mxu1 %v107_v59  ;;  %495 = vmatpush.msrb.mxu3 %v472_v0 }
  0x45   :  { %259 = vmatmul.f32.vlgmr.msrb.gmra.mxu1 %v25_v60  ;;  %596 = vmatpush.msra.mxu0 %v1499_v39 }
  0x46   :  { %707 = vmatpush.msra.mxu1 %v1485_v35  ;;  %820 = vmatpush.msra.mxu2 %v1499_v39 }
  0x47   :  { %597 = vmatpush.msra.mxu0 %v1514_v43  ;;  %496 = vmatpush.msrb.mxu3 %v471_v1 }
  0x48   :  { %708 = vmatpush.msra.mxu1 %v1499_v39  ;;  %821 = vmatpush.msra.mxu2 %v1514_v43 }
  0x49   :  { %598 = vmatpush.msra.mxu0 %v1536_v49  ;;  %497 = vmatpush.msrb.mxu3 %v470_v2 }
  0x4a   :  { %709 = vmatpush.msra.mxu1 %v1514_v43  ;;  %822 = vmatpush.msra.mxu2 %v1536_v49 }
  0x4b   :  { %599 = vmatpush.msra.mxu0 %v1550_v53  ;;  %498 = vmatpush.msrb.mxu3 %v469_v3 }
  0x4c   :  { %710 = vmatpush.msra.mxu1 %v1536_v49  ;;  %823 = vmatpush.msra.mxu2 %v1550_v53 }
  0x4d   :  { %600 = vmatpush.msra.mxu0 %v1569_v58  ;;  %499 = vmatpush.msrb.mxu3 %v468_v4 }
  0x4e   :  { %711 = vmatpush.msra.mxu1 %v1550_v53  ;;  %824 = vmatpush.msra.mxu2 %v1569_v58 }
  0x4f   :  { %601 = vmatpush.msra.mxu0 %v1580_v61  ;;  %500 = vmatpush.msrb.mxu3 %v467_v5 }
  0x50   :  { %712 = vmatpush.msra.mxu1 %v1569_v58  ;;  %825 = vmatpush.msra.mxu2 %v1580_v61 }
  0x51   :  { %602 = vmatpush.msra.mxu0 %v1587_v62  ;;  %501 = vmatpush.msrb.mxu3 %v466_v6 }
  0x52   :  { %713 = vmatpush.msra.mxu1 %v1580_v61  ;;  %826 = vmatpush.msra.mxu2 %v1587_v62 }
  0x53   :  { %603 = vmatpush.msra.mxu0 %v473_v63  ;;  %931 = vmatpush.msra.mxu3 %v1485_v35 }
  0x54   :  { %714 = vmatpush.msra.mxu1 %v1587_v62  ;;  %827 = vmatpush.msra.mxu2 %v473_v63 }
  0x55   :  { %604 = vmatpush.msra.mxu0 %v472_v0  ;;  %932 = vmatpush.msra.mxu3 %v1499_v39 }
  0x56   :  { %715 = vmatpush.msra.mxu1 %v473_v63  ;;  %828 = vmatpush.msra.mxu2 %v472_v0 }
  0x57   :  { %605 = vmatpush.msra.mxu0 %v471_v1  ;;  %933 = vmatpush.msra.mxu3 %v1514_v43 }
  0x58   :  { %716 = vmatpush.msra.mxu1 %v472_v0  ;;  %829 = vmatpush.msra.mxu2 %v471_v1 }
  0x59   :  { %606 = vmatpush.msra.mxu0 %v470_v2  ;;  %934 = vmatpush.msra.mxu3 %v1536_v49 }
  0x5a   :  { %717 = vmatpush.msra.mxu1 %v471_v1  ;;  %830 = vmatpush.msra.mxu2 %v470_v2 }
  0x5b   :  { %607 = vmatpush.msra.mxu0 %v469_v3  ;;  %935 = vmatpush.msra.mxu3 %v1550_v53 }
  0x5c   :  { %718 = vmatpush.msra.mxu1 %v470_v2  ;;  %831 = vmatpush.msra.mxu2 %v469_v3 }
  0x5d   :  { %608 = vmatpush.msra.mxu0 %v468_v4  ;;  %936 = vmatpush.msra.mxu3 %v1569_v58 }
  0x5e   :  { %719 = vmatpush.msra.mxu1 %v469_v3  ;;  %832 = vmatpush.msra.mxu2 %v468_v4 }
  0x5f   :  { %609 = vmatpush.msra.mxu0 %v467_v5  ;;  %937 = vmatpush.msra.mxu3 %v1580_v61 }
  0x60   :  { %720 = vmatpush.msra.mxu1 %v468_v4  ;;  %833 = vmatpush.msra.mxu2 %v467_v5 }
  0x61   :  { %610 = vmatpush.msra.mxu0 %v466_v6  ;;  %938 = vmatpush.msra.mxu3 %v1587_v62 }
  0x62   :  { %721 = vmatpush.msra.mxu1 %v467_v5  ;;  %834 = vmatpush.msra.mxu2 %v466_v6 }
  0x63   :  { %939 = vmatpush.msra.mxu3 %v473_v63 }
  0x64   :  { %722 = vmatpush.msra.mxu1 %v466_v6 }
  0x65   :  { %940 = vmatpush.msra.mxu3 %v472_v0 }
  0x67   :  { %941 = vmatpush.msra.mxu3 %v471_v1 }
  0x69   :  { %942 = vmatpush.msra.mxu3 %v470_v2 }
  0x6b   :  { %943 = vmatpush.msra.mxu3 %v469_v3 }
  0x6d   :  { %944 = vmatpush.msra.mxu3 %v468_v4 }
  0x6f   :  { %945 = vmatpush.msra.mxu3 %v467_v5 }
  0x71   :  { %946 = vmatpush.msra.mxu3 %v466_v6 }
  0xaa   :  { %v200_v11 = vpop.f32.mrf.mxu2 }
  0xae   :  { %v220_v13 = vpop.f32.mrf.mxu3 }
  0xb0   :  { %v180_v10 = vpop.f32.mrf.mxu1 }
  0xb1   :  { %v160_v8 = vpop.f32.mrf.mxu0 }
  0xb2   :  { %v161_v9 = vadd.f32 %v1123_v7, %v160_v8 }
  0xb4   :  { %v181_v12 = vadd.f32 %v180_v10, %v161_v9 }
  0xb6   :  { %v201_v14 = vadd.f32 %v200_v11, %v181_v12 }
  0xb8   :  { %v221_v15 = vadd.f32 %v220_v13, %v201_v14 }
  0xbf   :  { %v240_v16 = vpop.f32.mrf.mxu0 }
  0xc0   :  { %v241_v17 = vadd.f32 %v240_v16, %v221_v15 }
  0xc2   :  { %v260_v18 = vpop.f32.mrf.mxu1 }
  0xc3   :  { %v261_v19 = vadd.f32 %v260_v18, %v241_v17 }
  0xc4   :  { %v280_v20 = vpop.f32.mrf.mxu2 }
  0xc5   :  { %v1649_v21 = vadd.f32 %v280_v20, %v261_v19 }
  0xc7   :  { %vm288_vm0 = vcmp.gt.f32.partialorder %v1649_v21, 1.0  ;;  %v292_v22 = vmul.f32 0.9, %v1649_v21 }
  0xc8   :  { %1072 = vmatmul.msk.f32.vlgmr.msrb.gmra.mxu3 %vm288_vm0, %v1129_v23  ;;  %v1022_v26 = vsel %vm288_vm0, 1.0, %v1130_v25 }
  0xc9   :  { %v293_v24 = vadd.f32 %v292_v22, %v1649_v21 }
  0xcb   :  { %v294_v27 = vsub.f32 %v293_v24, %v1022_v26 }
  0xcd   :  { %vm295_vm1 = vcmp.gt.f32.partialorder %v294_v27, 1.0  ;;  %v299_v28 = vmul.f32 0.9, %v294_v27 }
  0xce   :  { %v1023_v30 = vsel %vm295_vm1, 1.0, %v1130_v25 }
  0xcf   :  { %v300_v29 = vadd.f32 %v299_v28, %v1649_v21 }
  0xd0   :  { %1073 = vmatmul.msk.f32.gmra.mxu3 %vm295_vm1, %v1129_v23 }
  0xd1   :  { %v301_v31 = vsub.f32 %v300_v29, %v1023_v30 }
  0xd3   :  { %vm302_vm2 = vcmp.gt.f32.partialorder %v301_v31, 1.0  ;;  %v306_v32 = vmul.f32 0.9, %v301_v31 }
  0xd4   :  { %v1024_v34 = vsel %vm302_vm2, 1.0, %v1130_v25 }
  0xd5   :  { %v307_v33 = vadd.f32 %v306_v32, %v1649_v21 }
  0xd7   :  { %v308_v35 = vsub.f32 %v307_v33, %v1024_v34 }
  0xd8   :  { %1074 = vmatmul.msk.f32.gmra.mxu3 %vm302_vm2, %v1129_v23 }
  0xd9   :  { %vm309_vm3 = vcmp.gt.f32.partialorder %v308_v35, 1.0  ;;  %v313_v36 = vmul.f32 0.9, %v308_v35 }
  0xda   :  { %v1025_v38 = vsel %vm309_vm3, 1.0, %v1130_v25 }
  0xdb   :  { %v314_v37 = vadd.f32 %v313_v36, %v1649_v21 }
  0xdd   :  { %v315_v39 = vsub.f32 %v314_v37, %v1025_v38 }
  0xdf   :  { %vm316_vm4 = vcmp.gt.f32.partialorder %v315_v39, 1.0  ;;  %v320_v40 = vmul.f32 0.9, %v315_v39 }
  0xe0   :  { %1075 = vmatmul.msk.f32.gmra.mxu3 %vm309_vm3, %v1129_v23  ;;  %v1026_v42 = vsel %vm316_vm4, 1.0, %v1130_v25 }
  0xe1   :  { %v321_v41 = vadd.f32 %v320_v40, %v1649_v21 }
  0xe3   :  { %v322_v43 = vsub.f32 %v321_v41, %v1026_v42 }
  0xe5   :  { %vm323_vm5 = vcmp.gt.f32.partialorder %v322_v43, 1.0  ;;  %v327_v44 = vmul.f32 0.9, %v322_v43 }
  0xe6   :  { %1077 = vmatmul.msk.f32.vlgmr.msra.gmra.mxu0 %vm323_vm5, %v1129_v23  ;;  %v1027_v46 = vsel %vm323_vm5, 1.0, %v1130_v25 }
  0xe7   :  { %v328_v45 = vadd.f32 %v327_v44, %v1649_v21 }
  0xe8   :  { %1076 = vmatmul.msk.f32.gmra.mxu3 %vm316_vm4, %v1129_v23 }
  0xe9   :  { %v329_v47 = vsub.f32 %v328_v45, %v1027_v46 }
  0xeb   :  { %vm330_vm6 = vcmp.gt.f32.partialorder %v329_v47, 1.0  ;;  %v334_v48 = vmul.f32 0.9, %v329_v47 }
  0xec   :  { %v1028_v50 = vsel %vm330_vm6, 1.0, %v1130_v25 }
  0xed   :  { %v335_v49 = vadd.f32 %v334_v48, %v1649_v21 }
  0xee   :  { %1078 = vmatmul.msk.f32.gmra.mxu0 %vm330_vm6, %v1129_v23 }
  0xef   :  { %v336_v51 = vsub.f32 %v335_v49, %v1028_v50 }
  0xf1   :  { %vm337_vm7 = vcmp.gt.f32.partialorder %v336_v51, 1.0  ;;  %v341_v52 = vmul.f32 0.9, %v336_v51 }
  0xf2   :  { %v1029_v54 = vsel %vm337_vm7, 1.0, %v1130_v25 }
  0xf3   :  { %v342_v53 = vadd.f32 %v341_v52, %v1649_v21 }
  0xf5   :  { %v343_v55 = vsub.f32 %v342_v53, %v1029_v54  ;;  %v1124_v53 = vld [vmem:[%s1777_s4] ss:$0 sm:$0xff] }
  0xf6   :  { %1079 = vmatmul.msk.f32.gmra.mxu0 %vm337_vm7, %v1129_v23 }
  0xf7   :  { %vm344_vm8 = vcmp.gt.f32.partialorder %v343_v55, 1.0  ;;  %v348_v56 = vmul.f32 0.9, %v343_v55 }
  0xf8   :  { %v1030_v58 = vsel %vm344_vm8, 1.0, %v1130_v25 }
  0xf9   :  { %v349_v57 = vadd.f32 %v348_v56, %v1649_v21 }
  0xfb   :  { %v350_v59 = vsub.f32 %v349_v57, %v1030_v58 }
  0xfd   :  { %vm351_vm9 = vcmp.gt.f32.partialorder %v350_v59, 1.0  ;;  %v355_v60 = vmul.f32 0.9, %v350_v59 }
  0xfe   :  { %1080 = vmatmul.msk.f32.gmra.mxu0 %vm344_vm8, %v1129_v23  ;;  %v1031_v62 = vsel %vm351_vm9, 1.0, %v1130_v25 }
  0xff   :  { %v356_v61 = vadd.f32 %v355_v60, %v1649_v21 }
 0x101   :  { %v357_v63 = vsub.f32 %v356_v61, %v1031_v62 }
 0x103   :  { %vm358_vm10 = vcmp.gt.f32.partialorder %v357_v63, 1.0  ;;  %v362_v0 = vmul.f32 0.9, %v357_v63 }
 0x104   :  { %1082 = vmatmul.msk.f32.vlgmr.msra.gmra.mxu1 %vm358_vm10, %v1129_v23  ;;  %v1032_v2 = vsel %vm358_vm10, 1.0, %v1130_v25 }
 0x105   :  { %v363_v1 = vadd.f32 %v362_v0, %v1649_v21 }
 0x106   :  { %1081 = vmatmul.msk.f32.gmra.mxu0 %vm351_vm9, %v1129_v23 }
 0x107   :  { %v364_v3 = vsub.f32 %v363_v1, %v1032_v2 }
 0x109   :  { %vm365_vm11 = vcmp.gt.f32.partialorder %v364_v3, 1.0  ;;  %v369_v4 = vmul.f32 0.9, %v364_v3 }
 0x10a   :  { %v1033_v6 = vsel %vm365_vm11, 1.0, %v1130_v25 }
 0x10b   :  { %v370_v5 = vadd.f32 %v369_v4, %v1649_v21 }
 0x10c   :  { %1083 = vmatmul.msk.f32.gmra.mxu1 %vm365_vm11, %v1129_v23 }
 0x10d   :  { %v371_v7 = vsub.f32 %v370_v5, %v1033_v6 }
 0x10f   :  { %vm372_vm12 = vcmp.gt.f32.partialorder %v371_v7, 1.0  ;;  %v376_v8 = vmul.f32 0.9, %v371_v7 }
 0x110   :  { %v1034_v10 = vsel %vm372_vm12, 1.0, %v1130_v25 }
 0x111   :  { %v377_v9 = vadd.f32 %v376_v8, %v1649_v21 }
 0x113   :  { %v378_v11 = vsub.f32 %v377_v9, %v1034_v10 }
 0x114   :  { %1084 = vmatmul.msk.f32.gmra.mxu1 %vm372_vm12, %v1129_v23 }
 0x115   :  { %vm379_vm13 = vcmp.gt.f32.partialorder %v378_v11, 1.0  ;;  %v383_v12 = vmul.f32 0.9, %v378_v11 }
 0x116   :  { %v1035_v14 = vsel %vm379_vm13, 1.0, %v1130_v25 }
 0x117   :  { %v384_v13 = vadd.f32 %v383_v12, %v1649_v21 }
 0x119   :  { %v385_v15 = vsub.f32 %v384_v13, %v1035_v14 }
 0x11b   :  { %vm386_vm14 = vcmp.gt.f32.partialorder %v385_v15, 1.0  ;;  %v390_v16 = vmul.f32 0.9, %v385_v15 }
 0x11c   :  { %1085 = vmatmul.msk.f32.gmra.mxu1 %vm379_vm13, %v1129_v23  ;;  %v1036_v18 = vsel %vm386_vm14, 1.0, %v1130_v25 }
 0x11d   :  { %v391_v17 = vadd.f32 %v390_v16, %v1649_v21 }
 0x11f   :  { %v392_v19 = vsub.f32 %v391_v17, %v1036_v18 }
 0x121   :  { %vm393_vm15 = vcmp.gt.f32.partialorder %v392_v19, 1.0  ;;  %v397_v20 = vmul.f32 0.9, %v392_v19 }
 0x122   :  { %1087 = vmatmul.msk.f32.vlgmr.msra.gmra.mxu2 %vm393_vm15, %v1129_v23  ;;  %v1037_v24 = vsel %vm393_vm15, 1.0, %v1130_v25 }
 0x123   :  { %v398_v22 = vadd.f32 %v397_v20, %v1649_v21 }
 0x124   :  { %1086 = vmatmul.msk.f32.gmra.mxu1 %vm386_vm14, %v1129_v23 }
 0x125   :  { %v399_v26 = vsub.f32 %v398_v22, %v1037_v24 }
 0x127   :  { %vm400_vm0 = vcmp.gt.f32.partialorder %v399_v26, 1.0  ;;  %v404_v27 = vmul.f32 0.9, %v399_v26 }
 0x128   :  { %v1038_v29 = vsel %vm400_vm0, 1.0, %v1130_v25 }
 0x129   :  { %v405_v28 = vadd.f32 %v404_v27, %v1649_v21 }
 0x12a   :  { %1088 = vmatmul.msk.f32.gmra.mxu2 %vm400_vm0, %v1129_v23 }
 0x12b   :  { %v406_v30 = vsub.f32 %v405_v28, %v1038_v29 }
 0x12d   :  { %vm407_vm1 = vcmp.gt.f32.partialorder %v406_v30, 1.0  ;;  %v411_v31 = vmul.f32 0.9, %v406_v30 }
 0x12e   :  { %v1039_v33 = vsel %vm407_vm1, 1.0, %v1130_v25 }
 0x12f   :  { %v412_v32 = vadd.f32 %v411_v31, %v1649_v21 }
 0x131   :  { %v413_v34 = vsub.f32 %v412_v32, %v1039_v33 }
 0x132   :  { %1089 = vmatmul.msk.f32.gmra.mxu2 %vm407_vm1, %v1129_v23 }
 0x133   :  { %vm414_vm2 = vcmp.gt.f32.partialorder %v413_v34, 1.0  ;;  %v418_v35 = vmul.f32 0.9, %v413_v34 }
 0x134   :  { %v1040_v37 = vsel %vm414_vm2, 1.0, %v1130_v25 }
 0x135   :  { %v419_v36 = vadd.f32 %v418_v35, %v1649_v21 }
 0x137   :  { %v420_v38 = vsub.f32 %v419_v36, %v1040_v37 }
 0x139   :  { %vm421_vm3 = vcmp.gt.f32.partialorder %v420_v38, 1.0  ;;  %v425_v39 = vmul.f32 0.9, %v420_v38 }
 0x13a   :  { %1090 = vmatmul.msk.f32.gmra.mxu2 %vm414_vm2, %v1129_v23  ;;  %v1041_v41 = vsel %vm421_vm3, 1.0, %v1130_v25 }
 0x13b   :  { %v426_v40 = vadd.f32 %v425_v39, %v1649_v21 }
 0x13d   :  { %v427_v42 = vsub.f32 %v426_v40, %v1041_v41 }
 0x13f   :  { %vm428_vm4 = vcmp.gt.f32.partialorder %v427_v42, 1.0  ;;  %v432_v43 = vmul.f32 0.9, %v427_v42 }
 0x140   :  { %1092 = vmatmul.msk.f32.vlgmr.msra.gmra.mxu3 %vm428_vm4, %v1129_v23  ;;  %v1042_v45 = vsel %vm428_vm4, 1.0, %v1130_v25 }
 0x141   :  { %v433_v44 = vadd.f32 %v432_v43, %v1649_v21 }
 0x142   :  { %1091 = vmatmul.msk.f32.gmra.mxu2 %vm421_vm3, %v1129_v23 }
 0x143   :  { %v434_v46 = vsub.f32 %v433_v44, %v1042_v45 }
 0x145   :  { %vm435_vm5 = vcmp.gt.f32.partialorder %v434_v46, 1.0  ;;  %v439_v47 = vmul.f32 0.9, %v434_v46 }
 0x146   :  { %v1043_v49 = vsel %vm435_vm5, 1.0, %v1130_v25 }
 0x147   :  { %v440_v48 = vadd.f32 %v439_v47, %v1649_v21 }
 0x148   :  { %1093 = vmatmul.msk.f32.gmra.mxu3 %vm435_vm5, %v1129_v23 }
 0x149   :  { %v441_v50 = vsub.f32 %v440_v48, %v1043_v49 }
 0x14b   :  { %v503_v51 = vpop.f32.mrf.mxu3  ;;  %vm442_vm6 = vcmp.gt.f32.partialorder %v441_v50, 1.0  ;;  %v446_v52 = vmul.f32 0.9, %v441_v50 }
 0x14c   :  { %v1044_v55 = vsel %vm442_vm6, 1.0, %v1130_v25  ;;  %v504_v57 = vadd.f32 %v1124_v53, %v503_v51 }
 0x14d   :  { %v447_v54 = vadd.f32 %v446_v52, %v1649_v21 }
 0x14e   :  { %vm520_vm7 = vcmp.gt.f32.partialorder %v504_v57, 1.0  ;;  %v526_v60 = vmul.f32 0.9, %v504_v57 }
 0x14f   :  { %v448_v56 = vsub.f32 %v447_v54, %v1044_v55  ;;  %v1726_v63 = vsel %vm520_vm7, 1.0, %v1130_v25  ;;  %v1126_v54 = vld [vmem:[%s1777_s4] ss:$0 sm:$0xff] }
 0x150   :  { %1094 = vmatmul.msk.f32.gmra.mxu3 %vm442_vm6, %v1129_v23 }
 0x151   :  { %v453_v59 = vmul.f32 0.9, %v448_v56  ;;  %vm449_vm8 = vcmp.gt.f32.partialorder %v448_v56, 1.0 }
 0x152   :  { %v1045_v2 = vsel %vm449_vm8, 1.0, %v1130_v25 }
 0x153   :  { %v506_v58 = vpop.f32.mrf.mxu3  ;;  %v454_v0 = vadd.f32 %v453_v59, %v1649_v21 }
 0x154   :  { %v507_v61 = vadd.f32 %v1124_v53, %v506_v58 }
 0x155   :  { %v455_v5 = vsub.f32 %v454_v0, %v1045_v2 }
 0x156   :  { %v527_v62 = vadd.f32 %v526_v60, %v507_v61 }
 0x157   :  { %vm456_vm10 = vcmp.gt.f32.partialorder %v455_v5, 1.0 }
 0x158   :  { %v528_v1 = vsub.f32 %v527_v62, %v1726_v63  ;;  %1095 = vmatmul.msk.f32.gmra.mxu3 %vm449_vm8, %v1129_v23 }
 0x15a   :  { %vm529_vm9 = vcmp.gt.f32.partialorder %v528_v1, 1.0  ;;  %v537_v7 = vmul.f32 0.9, %v528_v1 }
 0x15b   :  { %v509_v3 = vpop.f32.mrf.mxu3  ;;  %v1048_v4 = vsel %vm529_vm9, 1.0, %v1130_v25 }
 0x15c   :  { %v510_v6 = vadd.f32 %v1124_v53, %v509_v3  ;;  %532 = vrot.lane.b32.xlu0 %v1048_v4, %s1131_s13  ;;  %s1153_s13 = smov 46  }
 0x15e   :  { %v538_v8 = vadd.f32 %v537_v7, %v510_v6 }
 0x160   :  { %v539_v9 = vsub.f32 %v538_v8, %v1048_v4  ;;  %1096 = vmatmul.msk.f32.gmra.mxu3 %vm456_vm10, %v1129_v23  ;;  %v1125_v23 = vld [vmem:[%s1777_s4] ss:$0 sm:$0xff] }
 0x162   :  { %vm540_vm11 = vcmp.gt.f32.partialorder %v539_v9, 1.0  ;;  %v548_v12 = vmul.f32 0.9, %v539_v9 }
 0x163   :  { %v512_v21 = vpop.f32.mrf.mxu3  ;;  %v612_v10 = vpop.f32.mrf.mxu0  ;;  %v1049_v11 = vsel %vm540_vm11, 1.0, %v1130_v25 }
 0x164   :  { %v513_v13 = vadd.f32 %v1124_v53, %v512_v21  ;;  %543 = vrot.lane.b32.xlu0 %v1049_v11, %s1132_s14  ;;  %v613_v26 = vadd.f32 %v1125_v23, %v612_v10  ;;  %s1154_s14 = smov 48  }
 0x166   :  { %v549_v14 = vadd.f32 %v548_v12, %v513_v13 }
 0x168   :  { %v550_v15 = vsub.f32 %v549_v14, %v1049_v11 }
 0x16a   :  { %vm551_vm12 = vcmp.gt.f32.partialorder %v550_v15, 1.0  ;;  %v559_v20 = vmul.f32 0.9, %v550_v15 }
 0x16b   :  { %v515_v16 = vpop.f32.mrf.mxu3  ;;  %v615_v17 = vpop.f32.mrf.mxu0  ;;  %v1050_v18 = vsel %vm551_vm12, 1.0, %v1130_v25 }
 0x16c   :  { %v516_v19 = vadd.f32 %v1124_v53, %v515_v16  ;;  %554 = vrot.lane.b32.xlu1 %v1050_v18, %s1133_s15  ;;  %v616_v32 = vadd.f32 %v1125_v23, %v615_v17 }
 0x16e   :  { %v560_v22 = vadd.f32 %v559_v20, %v516_v19 }
 0x170   :  { %v561_v24 = vsub.f32 %v560_v22, %v1050_v18 }
 0x172   :  { %v627_v27 = vmul.f32 0.9, %v561_v24  ;;  %vm562_vm13 = vcmp.gt.f32.partialorder %v561_v24, 1.0 }
 0x173   :  { %v618_v28 = vpop.f32.mrf.mxu0  ;;  %v1051_v29 = vsel %vm562_vm13, 1.0, %v1130_v25 }
 0x174   :  { %565 = vrot.lane.b32.xlu1 %v1051_v29, %s1134_s18  ;;  %v628_v30 = vadd.f32 %v627_v27, %v613_v26  ;;  %v619_v38 = vadd.f32 %v1125_v23, %v618_v28 }
 0x176   :  { %v629_v31 = vsub.f32 %v628_v30, %v1051_v29 }
 0x178   :  { %v638_v33 = vmul.f32 0.9, %v629_v31  ;;  %vm630_vm14 = vcmp.gt.f32.partialorder %v629_v31, 1.0 }
 0x179   :  { %v1052_v34 = vsel %vm630_vm14, 1.0, %v1130_v25 }
 0x17a   :  { %633 = vrot.lane.b32.xlu2 %v1052_v34, %s1135_s19  ;;  %v639_v35 = vadd.f32 %v638_v33, %v616_v32 }
 0x17b   :  { %v621_v37 = vpop.f32.mrf.mxu0 }
 0x17c   :  { %v640_v36 = vsub.f32 %v639_v35, %v1052_v34  ;;  %v622_v44 = vadd.f32 %v1125_v23, %v621_v37 }
 0x17e   :  { %v649_v39 = vmul.f32 0.9, %v640_v36  ;;  %vm641_vm15 = vcmp.gt.f32.partialorder %v640_v36, 1.0 }
 0x17f   :  { %v1053_v42 = vsel %vm641_vm15, 1.0, %v1130_v25 }
 0x180   :  { %v650_v40 = vadd.f32 %v649_v39, %v619_v38 }
 0x181   :  { %v724_v41 = vpop.f32.mrf.mxu1 }
 0x182   :  { %644 = vrot.lane.b32.xlu2 %v1053_v42, %s1136_s20  ;;  %v651_v43 = vsub.f32 %v650_v40, %v1053_v42  ;;  %v725_v57 = vadd.f32 %v1126_v54, %v724_v41 }
 0x183   :  { %v624_v48 = vpop.f32.mrf.mxu0 }
 0x184   :  { %v660_v45 = vmul.f32 0.9, %v651_v43  ;;  %vm652_vm0 = vcmp.gt.f32.partialorder %v651_v43, 1.0  ;;  %v625_v51 = vadd.f32 %v1125_v23, %v624_v48  ;;  %v1127_v23 = vld [vmem:[%s1777_s4] ss:$0 sm:$0xff] }
 0x185   :  { %v1054_v46 = vsel %vm652_vm0, 1.0, %v1130_v25 }
 0x186   :  { %655 = vrot.lane.b32.xlu0 %v1054_v46, %s1137_s21  ;;  %v661_v47 = vadd.f32 %v660_v45, %v622_v44 }
 0x188   :  { %v662_v49 = vsub.f32 %v661_v47, %v1054_v46 }
 0x189   :  { %v727_v50 = vpop.f32.mrf.mxu1 }
 0x18a   :  { %vm663_vm1 = vcmp.gt.f32.partialorder %v662_v49, 1.0  ;;  %v671_v52 = vmul.f32 0.9, %v662_v49  ;;  %v728_v0 = vadd.f32 %v1126_v54, %v727_v50 }
 0x18b   :  { %v1055_v53 = vsel %vm663_vm1, 1.0, %v1130_v25 }
 0x18c   :  { %666 = vrot.lane.b32.xlu1 %v1055_v53, %s1138_s22  ;;  %v672_v55 = vadd.f32 %v671_v52, %v625_v51 }
 0x18e   :  { %v673_v56 = vsub.f32 %v672_v55, %v1055_v53  ;;  %v1128_v53 = vld [vmem:[%s1777_s4] ss:$0 sm:$0xff]  ;;  %s1150_s4 = smov 40  }
 0x190   :  { %vm674_vm2 = vcmp.gt.f32.partialorder %v673_v56, 1.0  ;;  %v739_v58 = vmul.f32 0.9, %v673_v56 }
 0x191   :  { %v730_v59 = vpop.f32.mrf.mxu1  ;;  %v1056_v60 = vsel %vm674_vm2, 1.0, %v1130_v25 }
 0x192   :  { %677 = vrot.lane.b32.xlu2 %v1056_v60, %s1139_s23  ;;  %v740_v61 = vadd.f32 %v739_v58, %v725_v57  ;;  %v731_v6 = vadd.f32 %v1126_v54, %v730_v59 }
 0x194   :  { %v741_v62 = vsub.f32 %v740_v61, %v1056_v60 }
 0x196   :  { %v750_v1 = vmul.f32 0.9, %v741_v62  ;;  %vm742_vm3 = vcmp.gt.f32.partialorder %v741_v62, 1.0 }
 0x197   :  { %v1057_v2 = vsel %vm742_vm3, 1.0, %v1130_v25 }
 0x198   :  { %v751_v3 = vadd.f32 %v750_v1, %v728_v0  ;;  %745 = vrot.lane.b32.xlu0 %v1057_v2, %s1140_s24 }
 0x199   :  { %v733_v5 = vpop.f32.mrf.mxu1 }
 0x19a   :  { %v752_v4 = vsub.f32 %v751_v3, %v1057_v2  ;;  %v734_v10 = vadd.f32 %v1126_v54, %v733_v5 }
 0x19c   :  { %v761_v7 = vmul.f32 0.9, %v752_v4  ;;  %vm753_vm4 = vcmp.gt.f32.partialorder %v752_v4, 1.0 }
 0x19d   :  { %v1058_v8 = vsel %vm753_vm4, 1.0, %v1130_v25 }
 0x19e   :  { %v762_v9 = vadd.f32 %v761_v7, %v731_v6  ;;  %756 = vrot.lane.b32.xlu1 %v1058_v8, %s1141_s25 }
 0x1a0   :  { %v763_v21 = vsub.f32 %v762_v9, %v1058_v8 }
 0x1a1   :  { %v736_v14 = vpop.f32.mrf.mxu1 }
 0x1a2   :  { %v772_v11 = vmul.f32 0.9, %v763_v21  ;;  %vm764_vm5 = vcmp.gt.f32.partialorder %v763_v21, 1.0  ;;  %v737_v17 = vadd.f32 %v1126_v54, %v736_v14 }
 0x1a3   :  { %v1059_v12 = vsel %vm764_vm5, 1.0, %v1130_v25 }
 0x1a4   :  { %v773_v13 = vadd.f32 %v772_v11, %v734_v10  ;;  %767 = vrot.lane.b32.xlu2 %v1059_v12, %s1142_s26 }
 0x1a5   :  { %v836_v15 = vpop.f32.mrf.mxu2 }
 0x1a6   :  { %v774_v16 = vsub.f32 %v773_v13, %v1059_v12  ;;  %v837_v26 = vadd.f32 %v1127_v23, %v836_v15 }
 0x1a8   :  { %v783_v18 = vmul.f32 0.9, %v774_v16  ;;  %vm775_vm6 = vcmp.gt.f32.partialorder %v774_v16, 1.0 }
 0x1a9   :  { %v1060_v19 = vsel %vm775_vm6, 1.0, %v1130_v25 }
 0x1aa   :  { %v784_v20 = vadd.f32 %v783_v18, %v737_v17  ;;  %778 = vrot.lane.b32.xlu0 %v1060_v19, %s1143_s29 }
 0x1ac   :  { %v785_v22 = vsub.f32 %v784_v20, %v1060_v19 }
 0x1ad   :  { %v839_v24 = vpop.f32.mrf.mxu2 }
 0x1ae   :  { %v851_v27 = vmul.f32 0.9, %v785_v22  ;;  %vm786_vm7 = vcmp.gt.f32.partialorder %v785_v22, 1.0  ;;  %v840_v31 = vadd.f32 %v1127_v23, %v839_v24 }
 0x1af   :  { %v1061_v28 = vsel %vm786_vm7, 1.0, %v1130_v25 }
 0x1b0   :  { %v852_v29 = vadd.f32 %v851_v27, %v837_v26  ;;  %789 = vrot.lane.b32.xlu1 %v1061_v28, %s1144_s30 }
 0x1b2   :  { %v853_v30 = vsub.f32 %v852_v29, %v1061_v28 }
 0x1b4   :  { %v862_v32 = vmul.f32 0.9, %v853_v30  ;;  %vm854_vm8 = vcmp.gt.f32.partialorder %v853_v30, 1.0 }
 0x1b5   :  { %v842_v33 = vpop.f32.mrf.mxu2  ;;  %v1062_v34 = vsel %vm854_vm8, 1.0, %v1130_v25 }
 0x1b6   :  { %v863_v35 = vadd.f32 %v862_v32, %v840_v31  ;;  %857 = vrot.lane.b32.xlu2 %v1062_v34, %s1145_s6  ;;  %v843_v37 = vadd.f32 %v1127_v23, %v842_v33 }
 0x1b8   :  { %v864_v36 = vsub.f32 %v863_v35, %v1062_v34 }
 0x1ba   :  { %v873_v38 = vmul.f32 0.9, %v864_v36  ;;  %vm865_vm9 = vcmp.gt.f32.partialorder %v864_v36, 1.0 }
 0x1bb   :  { %v1063_v39 = vsel %vm865_vm9, 1.0, %v1130_v25 }
 0x1bc   :  { %v874_v40 = vadd.f32 %v873_v38, %v843_v37  ;;  %868 = vrot.lane.b32.xlu0 %v1063_v39, %s1146_s7 }
 0x1bd   :  { %v845_v41 = vpop.f32.mrf.mxu2 }
 0x1be   :  { %v875_v42 = vsub.f32 %v874_v40, %v1063_v39  ;;  %v846_v43 = vadd.f32 %v1127_v23, %v845_v41 }
 0x1c0   :  { %v884_v44 = vmul.f32 0.9, %v875_v42  ;;  %vm876_vm10 = vcmp.gt.f32.partialorder %v875_v42, 1.0 }
 0x1c1   :  { %v1064_v45 = vsel %vm876_vm10, 1.0, %v1130_v25 }
 0x1c2   :  { %v885_v46 = vadd.f32 %v884_v44, %v846_v43  ;;  %879 = vrot.lane.b32.xlu1 %v1064_v45, %s1147_s8 }
 0x1c3   :  { %v948_v47 = vpop.f32.mrf.mxu3 }
 0x1c4   :  { %v886_v48 = vsub.f32 %v885_v46, %v1064_v45  ;;  %v949_v57 = vadd.f32 %v1128_v53, %v948_v47 }
 0x1c5   :  { %v848_v49 = vpop.f32.mrf.mxu2 }
 0x1c6   :  { %v849_v50 = vadd.f32 %v1127_v23, %v848_v49  ;;  %v895_v51 = vmul.f32 0.9, %v886_v48  ;;  %vm887_vm11 = vcmp.gt.f32.partialorder %v886_v48, 1.0 }
 0x1c7   :  { %v1065_v52 = vsel %vm887_vm11, 1.0, %v1130_v25 }
 0x1c8   :  { %v896_v54 = vadd.f32 %v895_v51, %v849_v50  ;;  %890 = vrot.lane.b32.xlu2 %v1065_v52, %s1148_s11 }
 0x1ca   :  { %v897_v55 = vsub.f32 %v896_v54, %v1065_v52 }
 0x1cb   :  { %v951_v56 = vpop.f32.mrf.mxu3 }
 0x1cc   :  { %v963_v58 = vmul.f32 0.9, %v897_v55  ;;  %vm898_vm12 = vcmp.gt.f32.partialorder %v897_v55, 1.0  ;;  %v952_v62 = vadd.f32 %v1128_v53, %v951_v56 }
 0x1cd   :  { %v1066_v59 = vsel %vm898_vm12, 1.0, %v1130_v25 }
 0x1ce   :  { %901 = vrot.lane.b32.xlu0 %v1066_v59, %s1149_s12  ;;  %v964_v60 = vadd.f32 %v963_v58, %v949_v57  ;;  %v533_v22 = vpop.permute.xlu0 %532 }
 0x1cf   :  { %v535_v27 = vadd.f32 %v1726_v63, %v533_v22 }
 0x1d0   :  { %v965_v61 = vsub.f32 %v964_v60, %v1066_v59 }
 0x1d2   :  { %v974_v0 = vmul.f32 0.9, %v965_v61  ;;  %vm966_vm13 = vcmp.gt.f32.partialorder %v965_v61, 1.0 }
 0x1d3   :  { %v954_v1 = vpop.f32.mrf.mxu3  ;;  %v1067_v2 = vsel %vm966_vm13, 1.0, %v1130_v25 }
 0x1d4   :  { %v975_v3 = vadd.f32 %v974_v0, %v952_v62  ;;  %969 = vrot.lane.b32.xlu1 %v1067_v2, %s1150_s4  ;;  %v955_v5 = vadd.f32 %v1128_v53, %v954_v1  ;;  %v634_v28 = vpop.permute.xlu2 %633 }
 0x1d6   :  { %v976_v4 = vsub.f32 %v975_v3, %v1067_v2  ;;  %v544_v26 = vpop.permute.xlu0 %543 }
 0x1d7   :  { %v546_v29 = vadd.f32 %v544_v26, %v535_v27 }
 0x1d8   :  { %v985_v6 = vmul.f32 0.9, %v976_v4  ;;  %vm977_vm14 = vcmp.gt.f32.partialorder %v976_v4, 1.0 }
 0x1d9   :  { %v1068_v7 = vsel %vm977_vm14, 1.0, %v1130_v25 }
 0x1da   :  { %v986_v8 = vadd.f32 %v985_v6, %v955_v5  ;;  %980 = vrot.lane.b32.xlu2 %v1068_v7, %s1151_s2 }
 0x1db   :  { %v957_v9 = vpop.f32.mrf.mxu3 }
 0x1dc   :  { %v987_v21 = vsub.f32 %v986_v8, %v1068_v7  ;;  %v958_v10 = vadd.f32 %v1128_v53, %v957_v9  ;;  %v645_v34 = vpop.permute.xlu2 %644 }
 0x1de   :  { %v996_v11 = vmul.f32 0.9, %v987_v21  ;;  %vm988_vm15 = vcmp.gt.f32.partialorder %v987_v21, 1.0  ;;  %v555_v24 = vpop.permute.xlu1 %554 }
 0x1df   :  { %v1069_v12 = vsel %vm988_vm15, 1.0, %v1130_v25  ;;  %v557_v31 = vadd.f32 %v555_v24, %v546_v29 }
 0x1e0   :  { %v997_v13 = vadd.f32 %v996_v11, %v958_v10  ;;  %991 = vrot.lane.b32.xlu0 %v1069_v12, %s1152_s3 }
 0x1e2   :  { %v998_v14 = vsub.f32 %v997_v13, %v1069_v12 }
 0x1e3   :  { %v960_v15 = vpop.f32.mrf.mxu3 }
 0x1e4   :  { %v961_v16 = vadd.f32 %v1128_v53, %v960_v15  ;;  %v1007_v17 = vmul.f32 0.9, %v998_v14  ;;  %vm999_vm0 = vcmp.gt.f32.partialorder %v998_v14, 1.0 }
 0x1e5   :  { %v1070_v18 = vsel %vm999_vm0, 1.0, %v1130_v25 }
 0x1e6   :  { %v1008_v19 = vadd.f32 %v1007_v17, %v961_v16  ;;  %1002 = vrot.lane.b32.xlu1 %v1070_v18, %s1153_s13  ;;  %v566_v30 = vpop.permute.xlu1 %565 }
 0x1e7   :  { %v568_v32 = vadd.f32 %v566_v30, %v557_v31 }
 0x1e8   :  { %v1009_v20 = vsub.f32 %v1008_v19, %v1070_v18 }
 0x1e9   :  { %v636_v33 = vadd.f32 %v634_v28, %v568_v32 }
 0x1ea   :  { %vm1010_vm1 = vcmp.gt.f32.partialorder %v1009_v20, 1.0 }
 0x1eb   :  { %v1071_v23 = vsel %vm1010_vm1, 1.0, %v1130_v25  ;;  %v647_v36 = vadd.f32 %v645_v34, %v636_v33 }
 0x1ec   :  { %1013 = vrot.lane.b32.xlu2 %v1071_v23, %s1154_s14  ;;  %v678_v25 = vpop.permute.xlu2 %677 }
 0x1f8   :  { %v656_v35 = vpop.permute.xlu0 %655 }
 0x1f9   :  { %v658_v38 = vadd.f32 %v656_v35, %v647_v36 }
 0x1fe   :  { %v667_v37 = vpop.permute.xlu1 %666  ;;  %v768_v45 = vpop.permute.xlu2 %767 }
 0x1ff   :  { %v669_v39 = vadd.f32 %v667_v37, %v658_v38 }
 0x201   :  { %v680_v41 = vadd.f32 %v678_v25, %v669_v39 }
 0x20a   :  { %v746_v40 = vpop.permute.xlu0 %745 }
 0x20b   :  { %v748_v43 = vadd.f32 %v746_v40, %v680_v41 }
 0x210   :  { %v757_v42 = vpop.permute.xlu1 %756  ;;  %v858_v50 = vpop.permute.xlu2 %857 }
 0x211   :  { %v759_v44 = vadd.f32 %v757_v42, %v748_v43 }
 0x213   :  { %v770_v46 = vadd.f32 %v768_v45, %v759_v44 }
 0x21c   :  { %v779_v63 = vpop.permute.xlu0 %778 }
 0x21d   :  { %v781_v48 = vadd.f32 %v779_v63, %v770_v46 }
 0x222   :  { %v790_v47 = vpop.permute.xlu1 %789  ;;  %v891_v56 = vpop.permute.xlu2 %890 }
 0x223   :  { %v792_v49 = vadd.f32 %v790_v47, %v781_v48 }
 0x225   :  { %v860_v52 = vadd.f32 %v858_v50, %v792_v49 }
 0x22e   :  { %v869_v51 = vpop.permute.xlu0 %868 }
 0x22f   :  { %v871_v54 = vadd.f32 %v869_v51, %v860_v52 }
 0x234   :  { %v880_v53 = vpop.permute.xlu1 %879  ;;  %v981_v62 = vpop.permute.xlu2 %980 }
 0x235   :  { %v882_v55 = vadd.f32 %v880_v53, %v871_v54 }
 0x237   :  { %v893_v58 = vadd.f32 %v891_v56, %v882_v55 }
 0x240   :  { %v902_v57 = vpop.permute.xlu0 %901 }
 0x241   :  { %v904_v60 = vadd.f32 %v902_v57, %v893_v58 }
 0x246   :  { %v970_v59 = vpop.permute.xlu1 %969  ;;  %v1014_v5 = vpop.permute.xlu2 %1013 }
 0x247   :  { %v972_v61 = vadd.f32 %v970_v59, %v904_v60 }
 0x249   :  { %v983_v1 = vadd.f32 %v981_v62, %v972_v61 }
 0x252   :  { %v992_v0 = vpop.permute.xlu0 %991 }
 0x253   :  { %v994_v2 = vadd.f32 %v992_v0, %v983_v1 }
 0x258   :  { %v1003_v3 = vpop.permute.xlu1 %1002 }
 0x259   :  { %v1005_v4 = vadd.f32 %v1003_v3, %v994_v2 }
 0x25b   :  { %v1016_v6 = vadd.f32 %v1014_v5, %v1005_v4 }
 0x25d   :  { %1017 = vst [vmem:[%s1778_s5] sm:$0xff] %v1016_v6 }

</bundles_post_ra>
